<compile_context>
chip_gen: v6e
topology: v6e:2x2x1
jax: 0.10.0
libtpu: 0.0.40
codegen_flags: <defaults>
</compile_context>

<pallas_src>
import jax
import jax.numpy as jnp
from jax.experimental import pallas as pl
from jax.experimental.pallas import tpu as pltpu

N_FREQ = 5
POS_DIM = 3 + 6 * N_FREQ          # 33 (raw xyz + IPE sin/cos)
Z_DIM = 64
IN_DIM = POS_DIM + Z_DIM          # 97  == input_dim = 33 + 64
OUT_CH = 4
C_HID = Z_DIM // 4                # 16 (f_color hidden width)
HEAD_DIM = C_HID + 1              # 17 (fused color-hidden + shape head)
LOCALITY_RATIO = 4.0 / 7.0
MAX_FG_LANES = 4096               # cap on (K-1)*tile per grid step (VMEM headroom)


def _round_up(n, m):
    return -(-n // m) * m


def _cdiv(a, b):
    return -(-a // b)


def _choose_tiling(pd, km1):
    """One large balanced tile set (no forced split on single-TC chips)."""
    max_tile = max(256, (MAX_FG_LANES // max(km1, 1)) // 128 * 128)
    pd128 = _round_up(max(pd, 1), 128)
    n_steps = _cdiv(pd128, max_tile)
    tile = _round_up(_cdiv(pd128, n_steps), 128)
    return tile, n_steps, tile * n_steps


# ----------------------------- fused Pallas kernel -----------------------------

def _decoder_kernel(
        bg_ref, fg_ref, mask_ref,
        # background: stacked first/skip weight, hidden weights, output head
        bw0, bw1, bw2, bwh, bw3, bw4, bw5,
        bb1, bb2, bb3, bb4, bb5,
        # foreground: stacked first/skip weight, hidden weights, fused head, color
        fw0, fw1, fw2, fwh, fw3, fw4, fwhd, fwc,
        fb1, fb2, fb3, fb4, fhdb, fcb,
        out_ref):
    f32 = jnp.float32

    def mm(w_ref, x):
        return jnp.dot(w_ref[...], x, preferred_element_type=f32)

    def relu(v):
        return jnp.maximum(v, 0.0)

    def trunk(x, w0, w1, w2, wh, w3, w4, b1, b2, b3, b4):
        # w0 is the stacked [layer0 ; skip(x-part)] weight -> one (128, F) GEMM.
        # The first-layer / skip-layer biases and the per-slot z terms are folded
        # into the one-hot input channels, so no bias add is needed for them.
        y0 = mm(w0, x)                                   # (128, N)
        h = relu(y0[:Z_DIM, :])
        skip = y0[Z_DIM:, :]
        h = relu(mm(w1, h) + b1[...])
        h = relu(mm(w2, h) + b2[...])
        t = relu(skip + mm(wh, h))                       # skip: Wx@x(+b,z) + Wh@h
        t = relu(mm(w3, t) + b3[...])
        t = relu(mm(w4, t) + b4[...])
        return t                                         # (64, N)

    T = bg_ref.shape[1]
    km1 = fg_ref.shape[1] // T
    K = km1 + 1

    # ---- background MLP ----
    tb = trunk(bg_ref[...], bw0, bw1, bw2, bwh, bw3, bw4, bb1, bb2, bb3, bb4)
    ob = mm(bw5, tb) + bb5[...]                          # (4, T)
    rgb_raw = [ob[:3, :]]                                # raw (pre-tanh) rgb
    sigma = [relu(ob[3:4, :])]                           # density_act

    # ---- foreground MLP: all K-1 slots batched along the lane axis ----
    tf = trunk(fg_ref[...], fw0, fw1, fw2, fwh, fw3, fw4, fb1, fb2, fb3, fb4)
    yf = relu(mm(fwhd, tf) + fhdb[...])                  # (17, (K-1)*T)
    rgb_f = mm(fwc, yf[:C_HID, :]) + fcb[...]            # (3, (K-1)*T)
    sig_f = yf[C_HID:C_HID + 1, :]                       # (1, (K-1)*T), relu'd

    # locality mask (world space, shared across fg slots), applied pre-activation
    m = mask_ref[...]                                    # (1, T) 0/1
    for k in range(km1):
        sl = slice(k * T, (k + 1) * T)                   # static, 128-aligned
        rgb_raw.append(rgb_f[:, sl] * m)
        sigma.append(sig_f[:, sl] * m)

    # ---- slot compositing (dens_noise == 0) ----
    sig = jnp.concatenate(sigma, axis=0)                 # (K, T)
    masks = sig / (jnp.sum(sig, axis=0, keepdims=True) + 1e-5)

    unmasked = []
    masked = []
    for s in range(K):
        u = jnp.concatenate([(jnp.tanh(rgb_raw[s]) + 1.0) * 0.5, sigma[s]], axis=0)
        unmasked.append(u)                               # (4, T)
        masked.append(u * masks[s:s + 1, :])
    raws = masked[0]
    for s in range(1, K):
        raws = raws + masked[s]

    rows = 4 + 8 * K + K
    pad_rows = out_ref.shape[0] - rows
    pieces = [raws] + masked + unmasked + [masks]
    if pad_rows:
        pieces.append(jnp.zeros((pad_rows, T), f32))
    out_ref[...] = jnp.concatenate(pieces, axis=0)


# ----------------------------- pallas_call wrapper -----------------------------

def _run_decoder(bg_cm, fg_cm, mask_cm, bg_w, fg_w, tile, km1, c_out):
    f_in, pd_pad = bg_cm.shape
    n_steps = pd_pad // tile
    all_w = list(bg_w) + list(fg_w)
    w_specs = [pl.BlockSpec(w.shape, lambda i: (0, 0)) for w in all_w]
    return pl.pallas_call(
        _decoder_kernel,
        out_shape=jax.ShapeDtypeStruct((c_out, pd_pad), jnp.float32),
        grid=(n_steps,),
        in_specs=[pl.BlockSpec((f_in, tile), lambda i: (0, i)),
                  pl.BlockSpec((f_in, km1 * tile), lambda i: (0, i)),
                  pl.BlockSpec((1, tile), lambda i: (0, i))] + w_specs,
        out_specs=pl.BlockSpec((c_out, tile), lambda i: (0, i)),
        compiler_params=pltpu.CompilerParams(
            dimension_semantics=("parallel",)),
    )(bg_cm, fg_cm, mask_cm, *all_w)


# ----------------------------- params (module layout + kernel packing) ----------

def init_params(key):
    keys = iter(jax.random.split(key, 40))

    def lin(fan_in, fan_out):
        kw, kb = jax.random.split(next(keys))
        bound = 1.0 / (fan_in ** 0.5)
        W = jax.random.uniform(kw, (fan_in, fan_out), jnp.float32, -bound, bound)
        b = jax.random.uniform(kb, (1, fan_out), jnp.float32, -bound, bound)
        return W, b

    p = {}
    # foreground path
    p['f_before'] = [lin(IN_DIM, Z_DIM), lin(Z_DIM, Z_DIM), lin(Z_DIM, Z_DIM)]
    p['f_after'] = [lin(Z_DIM + IN_DIM, Z_DIM), lin(Z_DIM, Z_DIM), lin(Z_DIM, Z_DIM)]
    p['f_after_latent'] = lin(Z_DIM, Z_DIM)
    p['f_after_shape'] = lin(Z_DIM, OUT_CH - 3)
    p['f_color'] = [lin(Z_DIM, C_HID), lin(C_HID, 3)]
    # background path
    p['b_before'] = [lin(IN_DIM, Z_DIM), lin(Z_DIM, Z_DIM), lin(Z_DIM, Z_DIM)]
    p['b_after'] = [lin(Z_DIM + IN_DIM, Z_DIM), lin(Z_DIM, Z_DIM), lin(Z_DIM, Z_DIM),
                    lin(Z_DIM, OUT_CH)]
    return p


def pack_params(p, z_slots, f_in):
    """Channel-major (out, in) f32 weights.  The z contribution + bias of the first
    layer and of the skip layer's x-part are folded into the one-hot slot columns
    of a stacked (128, f_in) first-layer weight.  f_after_latent is folded into
    f_color[0] and fused with the shape head."""
    f32 = jnp.float32
    z_bg = z_slots[0:1].astype(f32)
    z_fg = z_slots[1:].astype(f32)
    km1 = z_fg.shape[0]

    def cm(w):
        return jnp.asarray(w, f32).T                   # (out, in)

    def col(b):
        return jnp.asarray(b, f32).reshape(-1, 1)      # (out, 1)

    (fb0w, fb0b), (fb1w, fb1b), (fb2w, fb2b) = p['f_before']
    (fa0w, fa0b), (fa1w, fa1b), (fa2w, fa2b) = p['f_after']
    latw, latb = p['f_after_latent']
    shpw, shpb = p['f_after_shape']
    (c0w, c0b), (c1w, c1b) = p['f_color']
    (bb0w, bb0b), (bb1w, bb1b), (bb2w, bb2b) = p['b_before']
    (ba0w, ba0b), (ba1w, ba1b), (ba2w, ba2b), (ba3w, ba3b) = p['b_after']

    def stacked_first(w0, b0, ws, bs, z, n_id):
        # w0: (97, 64) first layer; ws: (161, 64) skip layer (rows 0:33 pos,
        # 33:97 z, 97:161 hidden).  Fold (z @ W_z + b) into one-hot columns.
        fold0 = z @ w0[POS_DIM:] + b0                          # (n_id, 64)
        folds = z @ ws[POS_DIM:POS_DIM + Z_DIM] + bs           # (n_id, 64)
        pad = jnp.zeros((Z_DIM, f_in - POS_DIM - n_id), f32)
        top = jnp.concatenate([w0[:POS_DIM].T, fold0.T, pad], axis=1)
        bot = jnp.concatenate([ws[:POS_DIM].T, folds.T, pad], axis=1)
        return jnp.concatenate([top, bot], axis=0).astype(f32)  # (128, f_in)

    bw0 = stacked_first(bb0w, bb0b, ba0w, ba0b, z_bg, 1)
    fw0 = stacked_first(fb0w, fb0b, fa0w, fa0b, z_fg, km1)

    # f_after_latent has no activation -> fold into f_color[0]; fuse shape head.
    fhw = jnp.concatenate([latw @ c0w, shpw], axis=1)           # (64, 17)
    fhb = jnp.concatenate([latb @ c0w + c0b, shpb], axis=1)     # (1, 17)

    bg_w = (bw0, cm(bb1w), cm(bb2w), cm(ba0w[POS_DIM + Z_DIM:]),
            cm(ba1w), cm(ba2w), cm(ba3w),
            col(bb1b), col(bb2b), col(ba1b), col(ba2b), col(ba3b))
    fg_w = (fw0, cm(fb1w), cm(fb2w), cm(fa0w[POS_DIM + Z_DIM:]),
            cm(fa1w), cm(fa2w), cm(fhw), cm(c1w),
            col(fb1b), col(fb2b), col(fa1b), col(fa2b), col(fhb), col(c1b))
    return bg_w, fg_w


# ----------------------------- glue (plain JAX, channel-major) -----------------

def integrated_pos_enc_cm(mean_cm, var_cm):
    # TODO(synk): PositionalEncoding source was not shipped with the module; this is
    # the standard mip-NeRF IPE (sin with a pi/2 phase shift giving cos, variance
    # attenuated) concatenated with raw coords -> 3 + 2*3*n_freq = 33 channels,
    # matching input_dim = 33 + z_dim.  Computed channel-major: (3, ...) -> (33, ...).
    rest = mean_cm.shape[1:]
    scales = 2.0 ** jnp.arange(N_FREQ, dtype=jnp.float32)
    sc = scales.reshape((N_FREQ, 1) + (1,) * len(rest))
    x = (sc * mean_cm[None]).reshape((3 * N_FREQ,) + rest)
    x = jnp.concatenate([x, x + 0.5 * jnp.pi], axis=0)
    y = ((sc * sc) * var_cm[None]).reshape((3 * N_FREQ,) + rest)
    y = jnp.concatenate([y, y], axis=0)
    return jnp.concatenate([mean_cm, jnp.exp(-0.5 * y) * jnp.sin(x)], axis=0)


def decoder_ipe_forward(params, mean, var, z_slots, fg_transform, fg_slot_position,
                        dens_noise=0.0):
    # TODO(synk): dens_noise randn term not implemented (forward default is 0.0);
    # fg_object_size bbox filtering (None path) not implemented.
    assert dens_noise == 0.0
    K = z_slots.shape[0]
    assert K >= 2
    km1 = K - 1
    P, D = mean.shape[0], mean.shape[1]
    pd = P * D

    mean_cm = mean.reshape(pd, 3).T.astype(jnp.float32)            # (3, pd)
    var_cm = var.reshape(pd, 3).T.astype(jnp.float32)              # (3, pd)

    # locality mask in world space (fixed_locality=True), shared across fg slots
    mask_loc = (jnp.sqrt(jnp.sum(mean_cm * mean_cm, axis=0))
                < LOCALITY_RATIO).astype(jnp.float32)              # (pd,)

    # ---- processQueries: transform points / slot centers into cam0 space ----
    tmat = fg_transform[0]                                         # (4, 4)
    rot, trans = tmat[:3, :3], tmat[:3, 3:4]
    mean_t = rot @ mean_cm + trans                                 # (3, pd)
    fsp_t = rot @ fg_slot_position.T + trans                       # (3, K-1)
    mean_fg_cm = mean_t[:, None, :] - fsp_t[:, :, None]            # (3, K-1, pd)
    var_fg_cm = jnp.broadcast_to(var_cm[:, None, :], (3, km1, pd))

    pos_bg = integrated_pos_enc_cm(mean_cm, var_cm)                # (33, pd)
    pos_fg = integrated_pos_enc_cm(mean_fg_cm, var_fg_cm)          # (33, K-1, pd)

    # ---- tiling + channel-major, lane-dense kernel inputs ----
    tile, n_steps, pd_pad = _choose_tiling(pd, km1)
    f_in = _round_up(POS_DIM + max(km1, 1), 8)                     # 40 for K=3

    # bg features: [pos(33) | ones(1) | zeros]  (ones channel carries the folded
    # z_bg term + first-layer/skip biases through the stacked weight).
    bg_feat = jnp.concatenate(
        [pos_bg, jnp.ones((1, pd), jnp.float32),
         jnp.zeros((f_in - POS_DIM - 1, pd), jnp.float32)], axis=0)
    bg_cm = jnp.pad(bg_feat, ((0, 0), (0, pd_pad - pd)))

    # fg features: [pos(33) | slot one-hot (K-1) | zeros], interleaved so every
    # grid step sees one contiguous (f_in, (K-1)*tile) block with all slots.
    onehot = jnp.broadcast_to(jnp.eye(km1, dtype=jnp.float32)[:, :, None],
                              (km1, km1, pd))
    fg_feat = jnp.concatenate(
        [pos_fg, onehot,
         jnp.zeros((f_in - POS_DIM - km1, km1, pd), jnp.float32)], axis=0)
    fg_feat = jnp.pad(fg_feat, ((0, 0), (0, 0), (0, pd_pad - pd)))
    fg_cm = (fg_feat.reshape(f_in, km1, n_steps, tile)
             .transpose(0, 2, 1, 3)
             .reshape(f_in, n_steps * km1 * tile))

    mask_cm = jnp.pad(mask_loc, (0, pd_pad - pd)).reshape(1, pd_pad)

    bg_w, fg_w = pack_params(params, z_slots, f_in)

    rows = 4 + 9 * K
    c_out = _round_up(rows, 8)

    # ---- fused Pallas hot path: bg MLP + batched fg MLP + slot compositing ----
    slab = _run_decoder(bg_cm, fg_cm, mask_cm, bg_w, fg_w, tile, km1, c_out)

    raws = slab[0:4, :pd].T                                        # (pd, 4)
    m0 = 4
    masked_raws = slab[m0:m0 + 4 * K, :pd].reshape(K, 4, pd).transpose(0, 2, 1)
    u0 = m0 + 4 * K
    unmasked_raws = slab[u0:u0 + 4 * K, :pd].reshape(K, 4, pd).transpose(0, 2, 1)
    k0 = u0 + 4 * K
    masks = slab[k0:k0 + K, :pd][:, :, None]                       # (K, pd, 1)
    return raws, masked_raws, unmasked_raws, masks


if __name__ == "__main__":
    key = jax.random.PRNGKey(0)
    k_par, k_mean, k_var, k_z, k_tr, k_pos = jax.random.split(key, 6)

    P, D, K = 64, 2, 3          # P = N*H*W rays, D samples/ray, K slots (1 bg + 2 fg)
    params = init_params(k_par)

    mean = 0.5 * jax.random.normal(k_mean, (P, D, 3), jnp.float32)
    var = 0.01 * jax.random.uniform(k_var, (P, D, 3), jnp.float32)
    z_slots = jax.random.normal(k_z, (K, Z_DIM), jnp.float32)
    fg_transform = (jnp.eye(4, dtype=jnp.float32)[None]
                    + 0.05 * jax.random.normal(k_tr, (1, 4, 4), jnp.float32)
                    .at[:, 3, :].set(0.0))
    fg_slot_position = 0.3 * jax.random.normal(k_pos, (K - 1, 3), jnp.float32)

    fwd = jax.jit(decoder_ipe_forward)
    outs = fwd(params, mean, var, z_slots, fg_transform, fg_slot_position)
    outs = jax.block_until_ready(outs)
    raws, masked_raws, unmasked_raws, masks = outs
    assert raws.shape == (P * D, OUT_CH)
    assert masked_raws.shape == (K, P * D, OUT_CH)
    assert unmasked_raws.shape == (K, P * D, OUT_CH)
    assert masks.shape == (K, P * D, 1)
    assert all(bool(jnp.all(jnp.isfinite(o))) for o in outs)
    print("KERNEL_OK")
</pallas_src>

<mosaic_0001>
module attributes {stable_mosaic.version = 11 : i64} {
  func.func @_decoder_kernel(%arg0: i32, %arg1: memref<40x128xf32, #tpu.memory_space<vmem>>, %arg2: memref<40x256xf32, #tpu.memory_space<vmem>>, %arg3: memref<1x128xf32, #tpu.memory_space<vmem>>, %arg4: memref<128x40xf32, #tpu.memory_space<vmem>>, %arg5: memref<64x64xf32, #tpu.memory_space<vmem>>, %arg6: memref<64x64xf32, #tpu.memory_space<vmem>>, %arg7: memref<64x64xf32, #tpu.memory_space<vmem>>, %arg8: memref<64x64xf32, #tpu.memory_space<vmem>>, %arg9: memref<64x64xf32, #tpu.memory_space<vmem>>, %arg10: memref<4x64xf32, #tpu.memory_space<vmem>>, %arg11: memref<64x1xf32, #tpu.memory_space<vmem>>, %arg12: memref<64x1xf32, #tpu.memory_space<vmem>>, %arg13: memref<64x1xf32, #tpu.memory_space<vmem>>, %arg14: memref<64x1xf32, #tpu.memory_space<vmem>>, %arg15: memref<4x1xf32, #tpu.memory_space<vmem>>, %arg16: memref<128x40xf32, #tpu.memory_space<vmem>>, %arg17: memref<64x64xf32, #tpu.memory_space<vmem>>, %arg18: memref<64x64xf32, #tpu.memory_space<vmem>>, %arg19: memref<64x64xf32, #tpu.memory_space<vmem>>, %arg20: memref<64x64xf32, #tpu.memory_space<vmem>>, %arg21: memref<64x64xf32, #tpu.memory_space<vmem>>, %arg22: memref<17x64xf32, #tpu.memory_space<vmem>>, %arg23: memref<3x16xf32, #tpu.memory_space<vmem>>, %arg24: memref<64x1xf32, #tpu.memory_space<vmem>>, %arg25: memref<64x1xf32, #tpu.memory_space<vmem>>, %arg26: memref<64x1xf32, #tpu.memory_space<vmem>>, %arg27: memref<64x1xf32, #tpu.memory_space<vmem>>, %arg28: memref<17x1xf32, #tpu.memory_space<vmem>>, %arg29: memref<3x1xf32, #tpu.memory_space<vmem>>, %arg30: memref<32x128xf32, #tpu.memory_space<vmem>>) attributes {dimension_semantics = [#tpu.dimension_semantics<parallel>], iteration_bounds = array<i64: 1>, scalar_prefetch = 0 : i64, scratch_operands = 0 : i64, tpu.core_type = #tpu.core_type<tc>, window_params = [{transform_indices = @transform_0, window_bounds = array<i64: 40, 128>}, {transform_indices = @transform_1, window_bounds = array<i64: 40, 256>}, {transform_indices = @transform_2, window_bounds = array<i64: 1, 128>}, {pipeline_mode = #tpu.pipeline_mode<synchronous>, transform_indices = @transform_3, window_bounds = array<i64: 128, 40>}, {pipeline_mode = #tpu.pipeline_mode<synchronous>, transform_indices = @transform_4, window_bounds = array<i64: 64, 64>}, {pipeline_mode = #tpu.pipeline_mode<synchronous>, transform_indices = @transform_5, window_bounds = array<i64: 64, 64>}, {pipeline_mode = #tpu.pipeline_mode<synchronous>, transform_indices = @transform_6, window_bounds = array<i64: 64, 64>}, {pipeline_mode = #tpu.pipeline_mode<synchronous>, transform_indices = @transform_7, window_bounds = array<i64: 64, 64>}, {pipeline_mode = #tpu.pipeline_mode<synchronous>, transform_indices = @transform_8, window_bounds = array<i64: 64, 64>}, {pipeline_mode = #tpu.pipeline_mode<synchronous>, transform_indices = @transform_9, window_bounds = array<i64: 4, 64>}, {pipeline_mode = #tpu.pipeline_mode<synchronous>, transform_indices = @transform_10, window_bounds = array<i64: 64, 1>}, {pipeline_mode = #tpu.pipeline_mode<synchronous>, transform_indices = @transform_11, window_bounds = array<i64: 64, 1>}, {pipeline_mode = #tpu.pipeline_mode<synchronous>, transform_indices = @transform_12, window_bounds = array<i64: 64, 1>}, {pipeline_mode = #tpu.pipeline_mode<synchronous>, transform_indices = @transform_13, window_bounds = array<i64: 64, 1>}, {pipeline_mode = #tpu.pipeline_mode<synchronous>, transform_indices = @transform_14, window_bounds = array<i64: 4, 1>}, {pipeline_mode = #tpu.pipeline_mode<synchronous>, transform_indices = @transform_15, window_bounds = array<i64: 128, 40>}, {pipeline_mode = #tpu.pipeline_mode<synchronous>, transform_indices = @transform_16, window_bounds = array<i64: 64, 64>}, {pipeline_mode = #tpu.pipeline_mode<synchronous>, transform_indices = @transform_17, window_bounds = array<i64: 64, 64>}, {pipeline_mode = #tpu.pipeline_mode<synchronous>, transform_indices = @transform_18, window_bounds = array<i64: 64, 64>}, {pipeline_mode = #tpu.pipeline_mode<synchronous>, transform_indices = @transform_19, window_bounds = array<i64: 64, 64>}, {pipeline_mode = #tpu.pipeline_mode<synchronous>, transform_indices = @transform_20, window_bounds = array<i64: 64, 64>}, {pipeline_mode = #tpu.pipeline_mode<synchronous>, transform_indices = @transform_21, window_bounds = array<i64: 17, 64>}, {pipeline_mode = #tpu.pipeline_mode<synchronous>, transform_indices = @transform_22, window_bounds = array<i64: 3, 16>}, {pipeline_mode = #tpu.pipeline_mode<synchronous>, transform_indices = @transform_23, window_bounds = array<i64: 64, 1>}, {pipeline_mode = #tpu.pipeline_mode<synchronous>, transform_indices = @transform_24, window_bounds = array<i64: 64, 1>}, {pipeline_mode = #tpu.pipeline_mode<synchronous>, transform_indices = @transform_25, window_bounds = array<i64: 64, 1>}, {pipeline_mode = #tpu.pipeline_mode<synchronous>, transform_indices = @transform_26, window_bounds = array<i64: 64, 1>}, {pipeline_mode = #tpu.pipeline_mode<synchronous>, transform_indices = @transform_27, window_bounds = array<i64: 17, 1>}, {pipeline_mode = #tpu.pipeline_mode<synchronous>, transform_indices = @transform_28, window_bounds = array<i64: 3, 1>}, {transform_indices = @transform_29, window_bounds = array<i64: 32, 128>}]} {
    %c0 = arith.constant 0 : index
    %c0_0 = arith.constant 0 : index
    %0 = vector.load %arg1[%c0, %c0_0] : memref<40x128xf32, #tpu.memory_space<vmem>>, vector<40x128xf32>
    %c0_1 = arith.constant 0 : index
    %c0_2 = arith.constant 0 : index
    %1 = vector.load %arg4[%c0_1, %c0_2] : memref<128x40xf32, #tpu.memory_space<vmem>>, vector<128x40xf32>
    %cst = arith.constant dense<0.000000e+00> : vector<128x128xf32>
    %2 = tpu.matmul %1, %0, %cst {dimension_numbers = #tpu.dot_dimension_numbers<[1], [0], [0], [1], [0, 0, 1, 1], [], []>} : vector<128x40xf32>, vector<40x128xf32>, vector<128x128xf32> -> vector<128x128xf32>
    %3 = vector.extract_strided_slice %2 {offsets = [0, 0], sizes = [64, 128], strides = [1, 1]} : vector<128x128xf32> to vector<64x128xf32>
    %cst_3 = arith.constant 0.000000e+00 : f32
    %4 = vector.broadcast %cst_3 : f32 to vector<64x128xf32>
    %5 = arith.maximumf %3, %4 : vector<64x128xf32>
    %6 = vector.extract_strided_slice %2 {offsets = [64, 0], sizes = [64, 128], strides = [1, 1]} : vector<128x128xf32> to vector<64x128xf32>
    %c0_4 = arith.constant 0 : index
    %c0_5 = arith.constant 0 : index
    %7 = vector.load %arg5[%c0_4, %c0_5] : memref<64x64xf32, #tpu.memory_space<vmem>>, vector<64x64xf32>
    %cst_6 = arith.constant dense<0.000000e+00> : vector<64x128xf32>
    %8 = tpu.matmul %7, %5, %cst_6 {dimension_numbers = #tpu.dot_dimension_numbers<[1], [0], [0], [1], [0, 0, 1, 1], [], []>} : vector<64x64xf32>, vector<64x128xf32>, vector<64x128xf32> -> vector<64x128xf32>
    %c0_7 = arith.constant 0 : index
    %c0_8 = arith.constant 0 : index
    %9 = vector.load %arg11[%c0_7, %c0_8] : memref<64x1xf32, #tpu.memory_space<vmem>>, vector<64x1xf32>
    %10 = vector.broadcast %9 : vector<64x1xf32> to vector<64x128xf32>
    %11 = arith.addf %8, %10 : vector<64x128xf32>
    %cst_9 = arith.constant 0.000000e+00 : f32
    %12 = vector.broadcast %cst_9 : f32 to vector<64x128xf32>
    %13 = arith.maximumf %11, %12 : vector<64x128xf32>
    %c0_10 = arith.constant 0 : index
    %c0_11 = arith.constant 0 : index
    %14 = vector.load %arg6[%c0_10, %c0_11] : memref<64x64xf32, #tpu.memory_space<vmem>>, vector<64x64xf32>
    %cst_12 = arith.constant dense<0.000000e+00> : vector<64x128xf32>
    %15 = tpu.matmul %14, %13, %cst_12 {dimension_numbers = #tpu.dot_dimension_numbers<[1], [0], [0], [1], [0, 0, 1, 1], [], []>} : vector<64x64xf32>, vector<64x128xf32>, vector<64x128xf32> -> vector<64x128xf32>
    %c0_13 = arith.constant 0 : index
    %c0_14 = arith.constant 0 : index
    %16 = vector.load %arg12[%c0_13, %c0_14] : memref<64x1xf32, #tpu.memory_space<vmem>>, vector<64x1xf32>
    %17 = vector.broadcast %16 : vector<64x1xf32> to vector<64x128xf32>
    %18 = arith.addf %15, %17 : vector<64x128xf32>
    %cst_15 = arith.constant 0.000000e+00 : f32
    %19 = vector.broadcast %cst_15 : f32 to vector<64x128xf32>
    %20 = arith.maximumf %18, %19 : vector<64x128xf32>
    %c0_16 = arith.constant 0 : index
    %c0_17 = arith.constant 0 : index
    %21 = vector.load %arg7[%c0_16, %c0_17] : memref<64x64xf32, #tpu.memory_space<vmem>>, vector<64x64xf32>
    %cst_18 = arith.constant dense<0.000000e+00> : vector<64x128xf32>
    %22 = tpu.matmul %21, %20, %cst_18 {dimension_numbers = #tpu.dot_dimension_numbers<[1], [0], [0], [1], [0, 0, 1, 1], [], []>} : vector<64x64xf32>, vector<64x128xf32>, vector<64x128xf32> -> vector<64x128xf32>
    %23 = arith.addf %6, %22 : vector<64x128xf32>
    %cst_19 = arith.constant 0.000000e+00 : f32
    %24 = vector.broadcast %cst_19 : f32 to vector<64x128xf32>
    %25 = arith.maximumf %23, %24 : vector<64x128xf32>
    %c0_20 = arith.constant 0 : index
    %c0_21 = arith.constant 0 : index
    %26 = vector.load %arg8[%c0_20, %c0_21] : memref<64x64xf32, #tpu.memory_space<vmem>>, vector<64x64xf32>
    %cst_22 = arith.constant dense<0.000000e+00> : vector<64x128xf32>
    %27 = tpu.matmul %26, %25, %cst_22 {dimension_numbers = #tpu.dot_dimension_numbers<[1], [0], [0], [1], [0, 0, 1, 1], [], []>} : vector<64x64xf32>, vector<64x128xf32>, vector<64x128xf32> -> vector<64x128xf32>
    %c0_23 = arith.constant 0 : index
    %c0_24 = arith.constant 0 : index
    %28 = vector.load %arg13[%c0_23, %c0_24] : memref<64x1xf32, #tpu.memory_space<vmem>>, vector<64x1xf32>
    %29 = vector.broadcast %28 : vector<64x1xf32> to vector<64x128xf32>
    %30 = arith.addf %27, %29 : vector<64x128xf32>
    %cst_25 = arith.constant 0.000000e+00 : f32
    %31 = vector.broadcast %cst_25 : f32 to vector<64x128xf32>
    %32 = arith.maximumf %30, %31 : vector<64x128xf32>
    %c0_26 = arith.constant 0 : index
    %c0_27 = arith.constant 0 : index
    %33 = vector.load %arg9[%c0_26, %c0_27] : memref<64x64xf32, #tpu.memory_space<vmem>>, vector<64x64xf32>
    %cst_28 = arith.constant dense<0.000000e+00> : vector<64x128xf32>
    %34 = tpu.matmul %33, %32, %cst_28 {dimension_numbers = #tpu.dot_dimension_numbers<[1], [0], [0], [1], [0, 0, 1, 1], [], []>} : vector<64x64xf32>, vector<64x128xf32>, vector<64x128xf32> -> vector<64x128xf32>
    %c0_29 = arith.constant 0 : index
    %c0_30 = arith.constant 0 : index
    %35 = vector.load %arg14[%c0_29, %c0_30] : memref<64x1xf32, #tpu.memory_space<vmem>>, vector<64x1xf32>
    %36 = vector.broadcast %35 : vector<64x1xf32> to vector<64x128xf32>
    %37 = arith.addf %34, %36 : vector<64x128xf32>
    %cst_31 = arith.constant 0.000000e+00 : f32
    %38 = vector.broadcast %cst_31 : f32 to vector<64x128xf32>
    %39 = arith.maximumf %37, %38 : vector<64x128xf32>
    %c0_32 = arith.constant 0 : index
    %c0_33 = arith.constant 0 : index
    %40 = vector.load %arg10[%c0_32, %c0_33] : memref<4x64xf32, #tpu.memory_space<vmem>>, vector<4x64xf32>
    %cst_34 = arith.constant dense<0.000000e+00> : vector<4x128xf32>
    %41 = tpu.matmul %40, %39, %cst_34 {dimension_numbers = #tpu.dot_dimension_numbers<[1], [0], [0], [1], [0, 0, 1, 1], [], []>} : vector<4x64xf32>, vector<64x128xf32>, vector<4x128xf32> -> vector<4x128xf32>
    %c0_35 = arith.constant 0 : index
    %c0_36 = arith.constant 0 : index
    %42 = vector.load %arg15[%c0_35, %c0_36] : memref<4x1xf32, #tpu.memory_space<vmem>>, vector<4x1xf32>
    %43 = vector.broadcast %42 : vector<4x1xf32> to vector<4x128xf32>
    %44 = arith.addf %41, %43 : vector<4x128xf32>
    %45 = vector.extract_strided_slice %44 {offsets = [0, 0], sizes = [3, 128], strides = [1, 1]} : vector<4x128xf32> to vector<3x128xf32>
    %46 = vector.extract_strided_slice %44 {offsets = [3, 0], sizes = [1, 128], strides = [1, 1]} : vector<4x128xf32> to vector<1x128xf32>
    %cst_37 = arith.constant 0.000000e+00 : f32
    %47 = vector.broadcast %cst_37 : f32 to vector<1x128xf32>
    %48 = arith.maximumf %46, %47 : vector<1x128xf32>
    %c0_38 = arith.constant 0 : index
    %c0_39 = arith.constant 0 : index
    %49 = vector.load %arg2[%c0_38, %c0_39] : memref<40x256xf32, #tpu.memory_space<vmem>>, vector<40x256xf32>
    %c0_40 = arith.constant 0 : index
    %c0_41 = arith.constant 0 : index
    %50 = vector.load %arg16[%c0_40, %c0_41] : memref<128x40xf32, #tpu.memory_space<vmem>>, vector<128x40xf32>
    %cst_42 = arith.constant dense<0.000000e+00> : vector<128x256xf32>
    %51 = tpu.matmul %50, %49, %cst_42 {dimension_numbers = #tpu.dot_dimension_numbers<[1], [0], [0], [1], [0, 0, 1, 1], [], []>} : vector<128x40xf32>, vector<40x256xf32>, vector<128x256xf32> -> vector<128x256xf32>
    %52 = vector.extract_strided_slice %51 {offsets = [0, 0], sizes = [64, 256], strides = [1, 1]} : vector<128x256xf32> to vector<64x256xf32>
    %cst_43 = arith.constant 0.000000e+00 : f32
    %53 = vector.broadcast %cst_43 : f32 to vector<64x256xf32>
    %54 = arith.maximumf %52, %53 : vector<64x256xf32>
    %55 = vector.extract_strided_slice %51 {offsets = [64, 0], sizes = [64, 256], strides = [1, 1]} : vector<128x256xf32> to vector<64x256xf32>
    %c0_44 = arith.constant 0 : index
    %c0_45 = arith.constant 0 : index
    %56 = vector.load %arg17[%c0_44, %c0_45] : memref<64x64xf32, #tpu.memory_space<vmem>>, vector<64x64xf32>
    %cst_46 = arith.constant dense<0.000000e+00> : vector<64x256xf32>
    %57 = tpu.matmul %56, %54, %cst_46 {dimension_numbers = #tpu.dot_dimension_numbers<[1], [0], [0], [1], [0, 0, 1, 1], [], []>} : vector<64x64xf32>, vector<64x256xf32>, vector<64x256xf32> -> vector<64x256xf32>
    %c0_47 = arith.constant 0 : index
    %c0_48 = arith.constant 0 : index
    %58 = vector.load %arg24[%c0_47, %c0_48] : memref<64x1xf32, #tpu.memory_space<vmem>>, vector<64x1xf32>
    %59 = vector.broadcast %58 : vector<64x1xf32> to vector<64x256xf32>
    %60 = arith.addf %57, %59 : vector<64x256xf32>
    %cst_49 = arith.constant 0.000000e+00 : f32
    %61 = vector.broadcast %cst_49 : f32 to vector<64x256xf32>
    %62 = arith.maximumf %60, %61 : vector<64x256xf32>
    %c0_50 = arith.constant 0 : index
    %c0_51 = arith.constant 0 : index
    %63 = vector.load %arg18[%c0_50, %c0_51] : memref<64x64xf32, #tpu.memory_space<vmem>>, vector<64x64xf32>
    %cst_52 = arith.constant dense<0.000000e+00> : vector<64x256xf32>
    %64 = tpu.matmul %63, %62, %cst_52 {dimension_numbers = #tpu.dot_dimension_numbers<[1], [0], [0], [1], [0, 0, 1, 1], [], []>} : vector<64x64xf32>, vector<64x256xf32>, vector<64x256xf32> -> vector<64x256xf32>
    %c0_53 = arith.constant 0 : index
    %c0_54 = arith.constant 0 : index
    %65 = vector.load %arg25[%c0_53, %c0_54] : memref<64x1xf32, #tpu.memory_space<vmem>>, vector<64x1xf32>
    %66 = vector.broadcast %65 : vector<64x1xf32> to vector<64x256xf32>
    %67 = arith.addf %64, %66 : vector<64x256xf32>
    %cst_55 = arith.constant 0.000000e+00 : f32
    %68 = vector.broadcast %cst_55 : f32 to vector<64x256xf32>
    %69 = arith.maximumf %67, %68 : vector<64x256xf32>
    %c0_56 = arith.constant 0 : index
    %c0_57 = arith.constant 0 : index
    %70 = vector.load %arg19[%c0_56, %c0_57] : memref<64x64xf32, #tpu.memory_space<vmem>>, vector<64x64xf32>
    %cst_58 = arith.constant dense<0.000000e+00> : vector<64x256xf32>
    %71 = tpu.matmul %70, %69, %cst_58 {dimension_numbers = #tpu.dot_dimension_numbers<[1], [0], [0], [1], [0, 0, 1, 1], [], []>} : vector<64x64xf32>, vector<64x256xf32>, vector<64x256xf32> -> vector<64x256xf32>
    %72 = arith.addf %55, %71 : vector<64x256xf32>
    %cst_59 = arith.constant 0.000000e+00 : f32
    %73 = vector.broadcast %cst_59 : f32 to vector<64x256xf32>
    %74 = arith.maximumf %72, %73 : vector<64x256xf32>
    %c0_60 = arith.constant 0 : index
    %c0_61 = arith.constant 0 : index
    %75 = vector.load %arg20[%c0_60, %c0_61] : memref<64x64xf32, #tpu.memory_space<vmem>>, vector<64x64xf32>
    %cst_62 = arith.constant dense<0.000000e+00> : vector<64x256xf32>
    %76 = tpu.matmul %75, %74, %cst_62 {dimension_numbers = #tpu.dot_dimension_numbers<[1], [0], [0], [1], [0, 0, 1, 1], [], []>} : vector<64x64xf32>, vector<64x256xf32>, vector<64x256xf32> -> vector<64x256xf32>
    %c0_63 = arith.constant 0 : index
    %c0_64 = arith.constant 0 : index
    %77 = vector.load %arg26[%c0_63, %c0_64] : memref<64x1xf32, #tpu.memory_space<vmem>>, vector<64x1xf32>
    %78 = vector.broadcast %77 : vector<64x1xf32> to vector<64x256xf32>
    %79 = arith.addf %76, %78 : vector<64x256xf32>
    %cst_65 = arith.constant 0.000000e+00 : f32
    %80 = vector.broadcast %cst_65 : f32 to vector<64x256xf32>
    %81 = arith.maximumf %79, %80 : vector<64x256xf32>
    %c0_66 = arith.constant 0 : index
    %c0_67 = arith.constant 0 : index
    %82 = vector.load %arg21[%c0_66, %c0_67] : memref<64x64xf32, #tpu.memory_space<vmem>>, vector<64x64xf32>
    %cst_68 = arith.constant dense<0.000000e+00> : vector<64x256xf32>
    %83 = tpu.matmul %82, %81, %cst_68 {dimension_numbers = #tpu.dot_dimension_numbers<[1], [0], [0], [1], [0, 0, 1, 1], [], []>} : vector<64x64xf32>, vector<64x256xf32>, vector<64x256xf32> -> vector<64x256xf32>
    %c0_69 = arith.constant 0 : index
    %c0_70 = arith.constant 0 : index
    %84 = vector.load %arg27[%c0_69, %c0_70] : memref<64x1xf32, #tpu.memory_space<vmem>>, vector<64x1xf32>
    %85 = vector.broadcast %84 : vector<64x1xf32> to vector<64x256xf32>
    %86 = arith.addf %83, %85 : vector<64x256xf32>
    %cst_71 = arith.constant 0.000000e+00 : f32
    %87 = vector.broadcast %cst_71 : f32 to vector<64x256xf32>
    %88 = arith.maximumf %86, %87 : vector<64x256xf32>
    %c0_72 = arith.constant 0 : index
    %c0_73 = arith.constant 0 : index
    %89 = vector.load %arg22[%c0_72, %c0_73] : memref<17x64xf32, #tpu.memory_space<vmem>>, vector<17x64xf32>
    %cst_74 = arith.constant dense<0.000000e+00> : vector<17x256xf32>
    %90 = tpu.matmul %89, %88, %cst_74 {dimension_numbers = #tpu.dot_dimension_numbers<[1], [0], [0], [1], [0, 0, 1, 1], [], []>} : vector<17x64xf32>, vector<64x256xf32>, vector<17x256xf32> -> vector<17x256xf32>
    %c0_75 = arith.constant 0 : index
    %c0_76 = arith.constant 0 : index
    %91 = vector.load %arg28[%c0_75, %c0_76] : memref<17x1xf32, #tpu.memory_space<vmem>>, vector<17x1xf32>
    %92 = vector.broadcast %91 : vector<17x1xf32> to vector<17x256xf32>
    %93 = arith.addf %90, %92 : vector<17x256xf32>
    %cst_77 = arith.constant 0.000000e+00 : f32
    %94 = vector.broadcast %cst_77 : f32 to vector<17x256xf32>
    %95 = arith.maximumf %93, %94 : vector<17x256xf32>
    %96 = vector.extract_strided_slice %95 {offsets = [0, 0], sizes = [16, 256], strides = [1, 1]} : vector<17x256xf32> to vector<16x256xf32>
    %c0_78 = arith.constant 0 : index
    %c0_79 = arith.constant 0 : index
    %97 = vector.load %arg23[%c0_78, %c0_79] : memref<3x16xf32, #tpu.memory_space<vmem>>, vector<3x16xf32>
    %cst_80 = arith.constant dense<0.000000e+00> : vector<3x256xf32>
    %98 = tpu.matmul %97, %96, %cst_80 {dimension_numbers = #tpu.dot_dimension_numbers<[1], [0], [0], [1], [0, 0, 1, 1], [], []>} : vector<3x16xf32>, vector<16x256xf32>, vector<3x256xf32> -> vector<3x256xf32>
    %c0_81 = arith.constant 0 : index
    %c0_82 = arith.constant 0 : index
    %99 = vector.load %arg29[%c0_81, %c0_82] : memref<3x1xf32, #tpu.memory_space<vmem>>, vector<3x1xf32>
    %100 = vector.broadcast %99 : vector<3x1xf32> to vector<3x256xf32>
    %101 = arith.addf %98, %100 : vector<3x256xf32>
    %102 = vector.extract_strided_slice %95 {offsets = [16, 0], sizes = [1, 256], strides = [1, 1]} : vector<17x256xf32> to vector<1x256xf32>
    %c0_83 = arith.constant 0 : index
    %c0_84 = arith.constant 0 : index
    %103 = vector.load %arg3[%c0_83, %c0_84] : memref<1x128xf32, #tpu.memory_space<vmem>>, vector<1x128xf32>
    %104 = vector.extract_strided_slice %101 {offsets = [0, 0], sizes = [3, 128], strides = [1, 1]} : vector<3x256xf32> to vector<3x128xf32>
    %105 = vector.broadcast %103 : vector<1x128xf32> to vector<3x128xf32>
    %106 = arith.mulf %104, %105 : vector<3x128xf32>
    %107 = vector.extract_strided_slice %102 {offsets = [0, 0], sizes = [1, 128], strides = [1, 1]} : vector<1x256xf32> to vector<1x128xf32>
    %108 = arith.mulf %107, %103 : vector<1x128xf32>
    %109 = vector.extract_strided_slice %101 {offsets = [0, 128], sizes = [3, 128], strides = [1, 1]} : vector<3x256xf32> to vector<3x128xf32>
    %110 = vector.broadcast %103 : vector<1x128xf32> to vector<3x128xf32>
    %111 = arith.mulf %109, %110 : vector<3x128xf32>
    %112 = vector.extract_strided_slice %102 {offsets = [0, 128], sizes = [1, 128], strides = [1, 1]} : vector<1x256xf32> to vector<1x128xf32>
    %113 = arith.mulf %112, %103 : vector<1x128xf32>
    %114 = tpu.concatenate %48, %108, %113 in 0 : vector<1x128xf32>, vector<1x128xf32>, vector<1x128xf32> -> vector<3x128xf32>
    %cst_85 = arith.constant dense<0.000000e+00> : vector<128xf32>
    %115 = vector.multi_reduction <add>, %114, %cst_85 [0] : vector<3x128xf32> to vector<128xf32>
    %116 = vector.shape_cast %115 : vector<128xf32> to vector<1x128xf32>
    %cst_86 = arith.constant 9.99999974E-6 : f32
    %117 = vector.broadcast %cst_86 : f32 to vector<1x128xf32>
    %118 = arith.addf %116, %117 : vector<1x128xf32>
    %119 = vector.broadcast %118 : vector<1x128xf32> to vector<3x128xf32>
    %120 = arith.divf %114, %119 : vector<3x128xf32>
    %121 = math.tanh %45 : vector<3x128xf32>
    %cst_87 = arith.constant 1.000000e+00 : f32
    %122 = vector.broadcast %cst_87 : f32 to vector<3x128xf32>
    %123 = arith.addf %121, %122 : vector<3x128xf32>
    %cst_88 = arith.constant 5.000000e-01 : f32
    %124 = vector.broadcast %cst_88 : f32 to vector<3x128xf32>
    %125 = arith.mulf %123, %124 : vector<3x128xf32>
    %126 = tpu.concatenate %125, %48 in 0 : vector<3x128xf32>, vector<1x128xf32> -> vector<4x128xf32>
    %127 = vector.extract_strided_slice %120 {offsets = [0, 0], sizes = [1, 128], strides = [1, 1]} : vector<3x128xf32> to vector<1x128xf32>
    %128 = vector.broadcast %127 : vector<1x128xf32> to vector<4x128xf32>
    %129 = arith.mulf %126, %128 : vector<4x128xf32>
    %130 = math.tanh %106 : vector<3x128xf32>
    %cst_89 = arith.constant 1.000000e+00 : f32
    %131 = vector.broadcast %cst_89 : f32 to vector<3x128xf32>
    %132 = arith.addf %130, %131 : vector<3x128xf32>
    %cst_90 = arith.constant 5.000000e-01 : f32
    %133 = vector.broadcast %cst_90 : f32 to vector<3x128xf32>
    %134 = arith.mulf %132, %133 : vector<3x128xf32>
    %135 = tpu.concatenate %134, %108 in 0 : vector<3x128xf32>, vector<1x128xf32> -> vector<4x128xf32>
    %136 = vector.extract_strided_slice %120 {offsets = [1, 0], sizes = [1, 128], strides = [1, 1]} : vector<3x128xf32> to vector<1x128xf32>
    %137 = vector.broadcast %136 : vector<1x128xf32> to vector<4x128xf32>
    %138 = arith.mulf %135, %137 : vector<4x128xf32>
    %139 = math.tanh %111 : vector<3x128xf32>
    %cst_91 = arith.constant 1.000000e+00 : f32
    %140 = vector.broadcast %cst_91 : f32 to vector<3x128xf32>
    %141 = arith.addf %139, %140 : vector<3x128xf32>
    %cst_92 = arith.constant 5.000000e-01 : f32
    %142 = vector.broadcast %cst_92 : f32 to vector<3x128xf32>
    %143 = arith.mulf %141, %142 : vector<3x128xf32>
    %144 = tpu.concatenate %143, %113 in 0 : vector<3x128xf32>, vector<1x128xf32> -> vector<4x128xf32>
    %145 = vector.extract_strided_slice %120 {offsets = [2, 0], sizes = [1, 128], strides = [1, 1]} : vector<3x128xf32> to vector<1x128xf32>
    %146 = vector.broadcast %145 : vector<1x128xf32> to vector<4x128xf32>
    %147 = arith.mulf %144, %146 : vector<4x128xf32>
    %148 = arith.addf %129, %138 : vector<4x128xf32>
    %149 = arith.addf %148, %147 : vector<4x128xf32>
    %cst_93 = arith.constant 0.000000e+00 : f32
    %150 = vector.broadcast %cst_93 : f32 to vector<1x128xf32>
    %151 = tpu.concatenate %149, %129, %138, %147, %126, %135, %144, %120, %150 in 0 : vector<4x128xf32>, vector<4x128xf32>, vector<4x128xf32>, vector<4x128xf32>, vector<4x128xf32>, vector<4x128xf32>, vector<4x128xf32>, vector<3x128xf32>, vector<1x128xf32> -> vector<32x128xf32>
    %c0_94 = arith.constant 0 : index
    %c0_95 = arith.constant 0 : index
    %152 = vector.load %arg30[%c0_94, %c0_95] : memref<32x128xf32, #tpu.memory_space<vmem>>, vector<32x128xf32>
    tpu.vector_store %arg30[%c0_94, %c0_95], %151 {strides = array<i32>} : memref<32x128xf32, #tpu.memory_space<vmem>>, vector<32x128xf32>,
    return
  }
  func.func @transform_0(%arg0: i32) -> (i32, i32) {
    %c0_i32 = arith.constant 0 : i32
    %c0_i32_0 = arith.constant 0 : i32
    return %c0_i32, %arg0 : i32, i32
  }
  func.func @transform_1(%arg0: i32) -> (i32, i32) {
    %c0_i32 = arith.constant 0 : i32
    %c0_i32_0 = arith.constant 0 : i32
    return %c0_i32, %arg0 : i32, i32
  }
  func.func @transform_2(%arg0: i32) -> (i32, i32) {
    %c0_i32 = arith.constant 0 : i32
    %c0_i32_0 = arith.constant 0 : i32
    return %c0_i32, %arg0 : i32, i32
  }
  func.func @transform_3(%arg0: i32) -> (i32, i32) {
    %c0_i32 = arith.constant 0 : i32
    %c0_i32_0 = arith.constant 0 : i32
    %c0_i32_1 = arith.constant 0 : i32
    return %c0_i32, %c0_i32_0 : i32, i32
  }
  func.func @transform_4(%arg0: i32) -> (i32, i32) {
    %c0_i32 = arith.constant 0 : i32
    %c0_i32_0 = arith.constant 0 : i32
    %c0_i32_1 = arith.constant 0 : i32
    return %c0_i32, %c0_i32_0 : i32, i32
  }
  func.func @transform_5(%arg0: i32) -> (i32, i32) {
    %c0_i32 = arith.constant 0 : i32
    %c0_i32_0 = arith.constant 0 : i32
    %c0_i32_1 = arith.constant 0 : i32
    return %c0_i32, %c0_i32_0 : i32, i32
  }
  func.func @transform_6(%arg0: i32) -> (i32, i32) {
    %c0_i32 = arith.constant 0 : i32
    %c0_i32_0 = arith.constant 0 : i32
    %c0_i32_1 = arith.constant 0 : i32
    return %c0_i32, %c0_i32_0 : i32, i32
  }
  func.func @transform_7(%arg0: i32) -> (i32, i32) {
    %c0_i32 = arith.constant 0 : i32
    %c0_i32_0 = arith.constant 0 : i32
    %c0_i32_1 = arith.constant 0 : i32
    return %c0_i32, %c0_i32_0 : i32, i32
  }
  func.func @transform_8(%arg0: i32) -> (i32, i32) {
    %c0_i32 = arith.constant 0 : i32
    %c0_i32_0 = arith.constant 0 : i32
    %c0_i32_1 = arith.constant 0 : i32
    return %c0_i32, %c0_i32_0 : i32, i32
  }
  func.func @transform_9(%arg0: i32) -> (i32, i32) {
    %c0_i32 = arith.constant 0 : i32
    %c0_i32_0 = arith.constant 0 : i32
    %c0_i32_1 = arith.constant 0 : i32
    return %c0_i32, %c0_i32_0 : i32, i32
  }
  func.func @transform_10(%arg0: i32) -> (i32, i32) {
    %c0_i32 = arith.constant 0 : i32
    %c0_i32_0 = arith.constant 0 : i32
    %c0_i32_1 = arith.constant 0 : i32
    return %c0_i32, %c0_i32_0 : i32, i32
  }
  func.func @transform_11(%arg0: i32) -> (i32, i32) {
    %c0_i32 = arith.constant 0 : i32
    %c0_i32_0 = arith.constant 0 : i32
    %c0_i32_1 = arith.constant 0 : i32
    return %c0_i32, %c0_i32_0 : i32, i32
  }
  func.func @transform_12(%arg0: i32) -> (i32, i32) {
    %c0_i32 = arith.constant 0 : i32
    %c0_i32_0 = arith.constant 0 : i32
    %c0_i32_1 = arith.constant 0 : i32
    return %c0_i32, %c0_i32_0 : i32, i32
  }
  func.func @transform_13(%arg0: i32) -> (i32, i32) {
    %c0_i32 = arith.constant 0 : i32
    %c0_i32_0 = arith.constant 0 : i32
    %c0_i32_1 = arith.constant 0 : i32
    return %c0_i32, %c0_i32_0 : i32, i32
  }
  func.func @transform_14(%arg0: i32) -> (i32, i32) {
    %c0_i32 = arith.constant 0 : i32
    %c0_i32_0 = arith.constant 0 : i32
    %c0_i32_1 = arith.constant 0 : i32
    return %c0_i32, %c0_i32_0 : i32, i32
  }
  func.func @transform_15(%arg0: i32) -> (i32, i32) {
    %c0_i32 = arith.constant 0 : i32
    %c0_i32_0 = arith.constant 0 : i32
    %c0_i32_1 = arith.constant 0 : i32
    return %c0_i32, %c0_i32_0 : i32, i32
  }
  func.func @transform_16(%arg0: i32) -> (i32, i32) {
    %c0_i32 = arith.constant 0 : i32
    %c0_i32_0 = arith.constant 0 : i32
    %c0_i32_1 = arith.constant 0 : i32
    return %c0_i32, %c0_i32_0 : i32, i32
  }
  func.func @transform_17(%arg0: i32) -> (i32, i32) {
    %c0_i32 = arith.constant 0 : i32
    %c0_i32_0 = arith.constant 0 : i32
    %c0_i32_1 = arith.constant 0 : i32
    return %c0_i32, %c0_i32_0 : i32, i32
  }
  func.func @transform_18(%arg0: i32) -> (i32, i32) {
    %c0_i32 = arith.constant 0 : i32
    %c0_i32_0 = arith.constant 0 : i32
    %c0_i32_1 = arith.constant 0 : i32
    return %c0_i32, %c0_i32_0 : i32, i32
  }
  func.func @transform_19(%arg0: i32) -> (i32, i32) {
    %c0_i32 = arith.constant 0 : i32
    %c0_i32_0 = arith.constant 0 : i32
    %c0_i32_1 = arith.constant 0 : i32
    return %c0_i32, %c0_i32_0 : i32, i32
  }
  func.func @transform_20(%arg0: i32) -> (i32, i32) {
    %c0_i32 = arith.constant 0 : i32
    %c0_i32_0 = arith.constant 0 : i32
    %c0_i32_1 = arith.constant 0 : i32
    return %c0_i32, %c0_i32_0 : i32, i32
  }
  func.func @transform_21(%arg0: i32) -> (i32, i32) {
    %c0_i32 = arith.constant 0 : i32
    %c0_i32_0 = arith.constant 0 : i32
    %c0_i32_1 = arith.constant 0 : i32
    return %c0_i32, %c0_i32_0 : i32, i32
  }
  func.func @transform_22(%arg0: i32) -> (i32, i32) {
    %c0_i32 = arith.constant 0 : i32
    %c0_i32_0 = arith.constant 0 : i32
    %c0_i32_1 = arith.constant 0 : i32
    return %c0_i32, %c0_i32_0 : i32, i32
  }
  func.func @transform_23(%arg0: i32) -> (i32, i32) {
    %c0_i32 = arith.constant 0 : i32
    %c0_i32_0 = arith.constant 0 : i32
    %c0_i32_1 = arith.constant 0 : i32
    return %c0_i32, %c0_i32_0 : i32, i32
  }
  func.func @transform_24(%arg0: i32) -> (i32, i32) {
    %c0_i32 = arith.constant 0 : i32
    %c0_i32_0 = arith.constant 0 : i32
    %c0_i32_1 = arith.constant 0 : i32
    return %c0_i32, %c0_i32_0 : i32, i32
  }
  func.func @transform_25(%arg0: i32) -> (i32, i32) {
    %c0_i32 = arith.constant 0 : i32
    %c0_i32_0 = arith.constant 0 : i32
    %c0_i32_1 = arith.constant 0 : i32
    return %c0_i32, %c0_i32_0 : i32, i32
  }
  func.func @transform_26(%arg0: i32) -> (i32, i32) {
    %c0_i32 = arith.constant 0 : i32
    %c0_i32_0 = arith.constant 0 : i32
    %c0_i32_1 = arith.constant 0 : i32
    return %c0_i32, %c0_i32_0 : i32, i32
  }
  func.func @transform_27(%arg0: i32) -> (i32, i32) {
    %c0_i32 = arith.constant 0 : i32
    %c0_i32_0 = arith.constant 0 : i32
    %c0_i32_1 = arith.constant 0 : i32
    return %c0_i32, %c0_i32_0 : i32, i32
  }
  func.func @transform_28(%arg0: i32) -> (i32, i32) {
    %c0_i32 = arith.constant 0 : i32
    %c0_i32_0 = arith.constant 0 : i32
    %c0_i32_1 = arith.constant 0 : i32
    return %c0_i32, %c0_i32_0 : i32, i32
  }
  func.func @transform_29(%arg0: i32) -> (i32, i32) {
    %c0_i32 = arith.constant 0 : i32
    %c0_i32_0 = arith.constant 0 : i32
    return %c0_i32, %arg0 : i32, i32
  }
}

</mosaic_0001>

<bundles_post_ra>
// kernel: decoder_ipe_forward.1
= control target key start
LH: loop header
LB: loop body
LE: loop exit
PB: predicated region body
PF: predicated region fallthrough
CT: control target
= control target key end

     0   :  { %v3403_v0 = vmov 0   ;;  %s3404_s6 = smov 3   ;;  %s3405_s10 = smov 10   ;;  %vm143_vm0 = vcmask 326656   ;;  %vm401_vm1 = vcmask 523264   ;;  %vm3424_vm2 = vmmov 0   ;;  %s3965_s0 = inlined_call_operand.smem [shape: u32[30], index: -1, kind: input, shape index: {}] }
   0x1   :  { %s1_s5 = sld [smem:[%s3965_s0]]   ;;  %3393 = vset.pattern.permute.xlu0 %v3403_v0  ;;  %3394 = vset.pattern.permute.xlu1 %v3403_v0  ;;  %s3406_s14 = smov 11   ;;  %vm2742_vm3 = vcmask 130048   ;;  %vm2837_vm4 = vcmask 1040384   ;;  %vm2839_vm5 = vcmask 1041408   ;;  %vm2841_vm6 = vcmask 1042432  }
   0x2   :  { %s3446_s9 = sld [smem:[%s3965_s0 + %s3404_s6]]   ;;  %s3407_s18 = smov 12   ;;  %vm2897_vm7 = vcmask 1043456   ;;  %vm2902_vm8 = vcmask 1046528  }
   0x3   :  { %s3451_s13 = sld [smem:[%s3965_s0 + %s3405_s10]]   ;;  %s3408_s22 = smov 13  }
   0x4   :  { %s3465_s17 = sld [smem:[%s3965_s0 + %s3406_s14]]   ;;  %s3409_s26 = smov 4  }
   0x5   :  { %s3489_s21 = sld [smem:[%s3965_s0 + %s3407_s18]]   ;;  %s3410_s30 = smov 23  }
   0x6   :  { %s3502_s25 = sld [smem:[%s3965_s0 + %s3408_s22]]   ;;  %s3411_s4 = smov 24  }
   0x7   :  { %v126_v1 = vld [vmem:[%s1_s5 + $0x20] sm:$0xff]  ;;  %v125_v2 = vld [vmem:[%s1_s5 + $0x18] sm:$0xff]  ;;  %v124_v4 = vld [vmem:[%s1_s5 + $0x10] sm:$0xff]  ;;  %s3511_s29 = sld [smem:[%s3965_s0 + %s3409_s26]]   ;;  %s3412_s8 = smov 25  }
   0x8   :  { %3168 = vmatprep.subr.mxu0 %v126_v1  ;;  %v127_v3 = vld [vmem:[%s3446_s9] sm:$0xff]  ;;  %v123_v5 = vld [vmem:[%s1_s5 + $0x8] sm:$0xff]  ;;  %v129_v12 = vld [vmem:[%s3446_s9 + $0x10] sm:$0xff]  ;;  %s2934_s3 = sld [smem:[%s3965_s0 + %s3410_s30]]   ;;  %s3417_s30 = smov 5  }
   0x9   :  { %3169 = vmatpush3.msra.mxu0 %v126_v1  ;;  %3178 = vmatprep.mubr.msk.f32.mxu0 %vm143_vm0, %v127_v3  ;;  %v360_v6 = vld [vmem:[%s3451_s13 + $0x38] sm:$0xff]  ;;  %v358_v7 = vld [vmem:[%s3451_s13 + $0x28] sm:$0xff]  ;;  %v122_v8 = vld [vmem:[%s1_s5] sm:$0xff]  ;;  %s3529_s7 = sld [smem:[%s3965_s0 + %s3411_s4]]   ;;  %s3420_s11 = smov 8  }
   0xa   :  { %3170 = vmatprep.subr.mxu0 %v125_v2  ;;  %398 = vperm.xlu0 %3393, %v360_v6   ;;  %v359_v9 = vld [vmem:[%s3451_s13 + $0x30] sm:$0xff]  ;;  %v357_v10 = vld [vmem:[%s3451_s13 + $0x20] sm:$0xff]  ;;  %v128_v11 = vld [vmem:[%s3446_s9 + $0x8] sm:$0xff]  ;;  %s3538_s12 = sld [smem:[%s3965_s0 + %s3412_s8]]   ;;  %s3422_s15 = smov 1  }
   0xb   :  { %3171 = vmatpush3.msra.mxu0 %v125_v2  ;;  %388 = vperm.xlu1 %3394, %v358_v7   ;;  %v356_v13 = vld [vmem:[%s3451_s13 + $0x18] sm:$0xff]  ;;  %v355_v14 = vld [vmem:[%s3451_s13 + $0x10] sm:$0xff]  ;;  %v131_v16 = vld [vmem:[%s3446_s9 + $0x20] sm:$0xff]  ;;  %s3670_s14 = sld [smem:[%s3965_s0 + %s3420_s11]]   ;;  %s3423_s19 = smov 15  }
   0xc   :  { %3172 = vmatprep.subr.mxu0 %v124_v4  ;;  %v130_v15 = vld [vmem:[%s3446_s9 + $0x18] sm:$0xff]  ;;  %v354_v17 = vld [vmem:[%s3451_s13 + $0x8] sm:$0xff]  ;;  %v353_v18 = vld [vmem:[%s3451_s13] sm:$0xff]  ;;  %s3413_s13 = smov 26   ;;  %s3678_s18 = sld [smem:[%s3965_s0 + %s3422_s15]]  }
   0xd   :  { %3173 = vmatpush3.msra.mxu0 %v124_v4  ;;  %v132_v19 = vld [vmem:[%s3446_s9 + $0x28] sm:$0xff]  ;;  %v133_v20 = vld [vmem:[%s3446_s9 + $0x30] sm:$0xff]  ;;  %v554_v21 = vld [vmem:[%s3465_s17 + $0x38] sm:$0xff]  ;;  %s3551_s16 = sld [smem:[%s3965_s0 + %s3413_s13]]   ;;  %s3425_s23 = smov 9  }
   0xe   :  { %3174 = vmatprep.subr.mxu0 %v123_v5  ;;  %393 = vperm.xlu0 %3393, %v359_v9   ;;  %v553_v22 = vld [vmem:[%s3465_s17 + $0x30] sm:$0xff]  ;;  %v134_v23 = vld [vmem:[%s3446_s9 + $0x38] sm:$0xff]  ;;  %v552_v24 = vld [vmem:[%s3465_s17 + $0x28] sm:$0xff]  ;;  %s3701_s22 = sld [smem:[%s3965_s0 + %s3423_s19]]   ;;  %s3426_s27 = smov 16  }
   0xf   :  { %3175 = vmatpush3.msra.mxu0 %v123_v5  ;;  %383 = vperm.xlu1 %3394, %v357_v10   ;;  %v550_v25 = vld [vmem:[%s3465_s17 + $0x18] sm:$0xff]  ;;  %v548_v26 = vld [vmem:[%s3465_s17 + $0x8] sm:$0xff]  ;;  %v551_v27 = vld [vmem:[%s3465_s17 + $0x20] sm:$0xff]  ;;  %s2920_s26 = sld [smem:[%s3965_s0 + %s3425_s23]]   ;;  %s3427_s2 = smov 17  }
  0x10   :  { %3176 = vmatprep.subr.mxu0 %v122_v8  ;;  %v900_v28 = vld [vmem:[%s3489_s21 + $0x38] sm:$0xff]  ;;  %v549_v29 = vld [vmem:[%s3465_s17 + $0x10] sm:$0xff]  ;;  %v898_v30 = vld [vmem:[%s3489_s21 + $0x28] sm:$0xff]  ;;  %s3756_s1 = sld [smem:[%s3965_s0 + %s3426_s27]]   ;;  %s3428_s5 = smov 18  }
  0x11   :  { %3177 = vmatpush3.msra.mxu0 %v122_v8  ;;  %v547_v31 = vld [vmem:[%s3465_s17] sm:$0xff]  ;;  %v896_v32 = vld [vmem:[%s3489_s21 + $0x18] sm:$0xff]  ;;  %v899_v33 = vld [vmem:[%s3489_s21 + $0x30] sm:$0xff]  ;;  %s3414_s17 = smov 27   ;;  %s3790_s4 = sld [smem:[%s3965_s0 + %s3427_s2]]  }
  0x12   :  { %3179 = vmatmul.mubr.msk.f32.vlgmr.msra.gmra.mxu0 %vm143_vm0, %v128_v11  ;;  %378 = vperm.xlu0 %3393, %v356_v13   ;;  %v894_v34 = vld [vmem:[%s3489_s21 + $0x8] sm:$0xff]  ;;  %v897_v35 = vld [vmem:[%s3489_s21 + $0x20] sm:$0xff]  ;;  %v1093_v36 = vld [vmem:[%s3502_s25 + $0x38] sm:$0xff]  ;;  %s2938_s20 = sld [smem:[%s3965_s0 + %s3414_s17]]   ;;  %s3429_s8 = smov 19  }
  0x13   :  { %3181 = vmatprep.mubr.msk.f32.mxu0 %vm143_vm0, %v129_v12  ;;  %373 = vperm.xlu1 %3394, %v355_v14   ;;  %v895_v37 = vld [vmem:[%s3489_s21 + $0x10] sm:$0xff]  ;;  %v1091_v38 = vld [vmem:[%s3502_s25 + $0x28] sm:$0xff]  ;;  %v893_v39 = vld [vmem:[%s3489_s21] sm:$0xff]  ;;  %s3415_s21 = smov 28   ;;  %s3430_s13 = smov 20  }
  0x14   :  { %v1089_v40 = vld [vmem:[%s3502_s25 + $0x18] sm:$0xff]  ;;  %v1092_v41 = vld [vmem:[%s3502_s25 + $0x30] sm:$0xff]  ;;  %v345_v42 = vld [vmem:[%s3511_s29] sm:$0xff]  ;;  %s2939_s24 = sld [smem:[%s3965_s0 + %s3415_s21]]   ;;  %s3431_s17 = smov 21  }
  0x15   :  { %3218 = vmatprep.mubr.msk.f32.mxu1 %vm401_vm1, %v345_v42  ;;  %v1087_v43 = vld [vmem:[%s3502_s25 + $0x8] sm:$0xff]  ;;  %v1090_v44 = vld [vmem:[%s3502_s25 + $0x20] sm:$0xff]  ;;  %v1088_v45 = vld [vmem:[%s3502_s25 + $0x10] sm:$0xff]  ;;  %s3432_s21 = smov 22  }
  0x16   :  { %3182 = vmatmul.mubr.msk.f32.gmra.mxu0 %vm143_vm0, %v130_v15  ;;  %368 = vperm.xlu0 %3393, %v354_v17   ;;  %v1618_v46 = vld [vmem:[%s2934_s3 + $0x38] sm:$0xff]  ;;  %v1616_v47 = vld [vmem:[%s2934_s3 + $0x28] sm:$0xff]  ;;  %v1086_v48 = vld [vmem:[%s3502_s25] sm:$0xff]  ;;  %s3416_s25 = smov 14  }
  0x17   :  { %3184 = vmatprep.mubr.msk.f32.mxu0 %vm143_vm0, %v131_v16  ;;  %363 = vperm.xlu1 %3394, %v353_v18   ;;  %v1614_v49 = vld [vmem:[%s2934_s3 + $0x18] sm:$0xff]  ;;  %v1617_v50 = vld [vmem:[%s2934_s3 + $0x30] sm:$0xff]  ;;  %v1612_v51 = vld [vmem:[%s2934_s3 + $0x8] sm:$0xff]  ;;  %s2925_s28 = sld [smem:[%s3965_s0 + %s3416_s25]]   ;;  %s3433_s25 = smov 2  }
  0x18   :  { %v1615_v52 = vld [vmem:[%s2934_s3 + $0x20] sm:$0xff]  ;;  %v1827_v53 = vld [vmem:[%s3529_s7 + $0x38] sm:$0xff]  ;;  %v1613_v54 = vld [vmem:[%s2934_s3 + $0x10] sm:$0xff] }
  0x19   :  { %v1825_v55 = vld [vmem:[%s3529_s7 + $0x28] sm:$0xff]  ;;  %v1611_v56 = vld [vmem:[%s2934_s3] sm:$0xff]  ;;  %v1823_v57 = vld [vmem:[%s3529_s7 + $0x18] sm:$0xff]  ;;  %s3591_s3 = sld [smem:[%s3965_s0 + %s3417_s30]]   ;;  %s3434_s30 = smov 29  }
  0x1a   :  { %3185 = vmatmul.mubr.msk.f32.gmra.mxu0 %vm143_vm0, %v132_v19  ;;  %592 = vperm.xlu0 %3393, %v554_v21   ;;  %v1826_v58 = vld [vmem:[%s3529_s7 + $0x30] sm:$0xff]  ;;  %v1821_v59 = vld [vmem:[%s3529_s7 + $0x8] sm:$0xff]  ;;  %v1824_v60 = vld [vmem:[%s3529_s7 + $0x20] sm:$0xff] }
  0x1b   :  { %3187 = vmatprep.mubr.msk.f32.mxu0 %vm143_vm0, %v133_v20  ;;  %587 = vperm.xlu1 %3394, %v553_v22   ;;  %v2213_v61 = vld [vmem:[%s3538_s12 + $0x38] sm:$0xff]  ;;  %v1822_v62 = vld [vmem:[%s3529_s7 + $0x10] sm:$0xff]  ;;  %v2211_v63 = vld [vmem:[%s3538_s12 + $0x28] sm:$0xff] }
  0x1c   :  { %v1820_v0 = vld [vmem:[%s3529_s7] sm:$0xff]  ;;  %v2209_v1 = vld [vmem:[%s3538_s12 + $0x18] sm:$0xff]  ;;  %v2212_v2 = vld [vmem:[%s3538_s12 + $0x30] sm:$0xff]  ;;  %s3843_s7 = sld [smem:[%s3965_s0 + %s3428_s5]]  }
  0x1d   :  { %v2207_v3 = vld [vmem:[%s3538_s12 + $0x8] sm:$0xff]  ;;  %v2210_v4 = vld [vmem:[%s3538_s12 + $0x20] sm:$0xff]  ;;  %v2422_v5 = vld [vmem:[%s3551_s16 + $0x38] sm:$0xff] }
  0x1e   :  { %3188 = vmatmul.mubr.msk.f32.gmra.mxu0 %vm143_vm0, %v134_v23  ;;  %582 = vperm.xlu0 %3393, %v552_v24   ;;  %v2208_v6 = vld [vmem:[%s3538_s12 + $0x10] sm:$0xff]  ;;  %v2420_v7 = vld [vmem:[%s3551_s16 + $0x28] sm:$0xff]  ;;  %v2206_v8 = vld [vmem:[%s3538_s12] sm:$0xff]  ;;  %s3876_s12 = sld [smem:[%s3965_s0 + %s3429_s8]]  }
  0x1f   :  { %577 = vperm.xlu1 %3394, %v551_v27   ;;  %v2418_v9 = vld [vmem:[%s3551_s16 + $0x18] sm:$0xff]  ;;  %v2421_v10 = vld [vmem:[%s3551_s16 + $0x30] sm:$0xff]  ;;  %v2416_v11 = vld [vmem:[%s3551_s16 + $0x8] sm:$0xff] }
  0x20   :  { %v2419_v12 = vld [vmem:[%s3551_s16 + $0x20] sm:$0xff]  ;;  %v2620_v13 = vld [vmem:[%s2938_s20 + $0x8] sm:$0xff]  ;;  %v2417_v14 = vld [vmem:[%s3551_s16 + $0x10] sm:$0xff] }
  0x21   :  { %v2621_v15 = vld [vmem:[%s2938_s20 + $0x10] sm:$0x1]  ;;  %v2415_v16 = vld [vmem:[%s3551_s16] sm:$0xff]  ;;  %v352_v42 = vld [vmem:[%s3511_s29 + $0x38] sm:$0xff]  ;;  %s3907_s16 = sld [smem:[%s3965_s0 + %s3430_s13]]  }
  0x22   :  { %572 = vperm.xlu0 %3393, %v550_v25   ;;  %v2736_v17 = vld [vmem:[%s2939_s24] sm:$0x7]  ;;  %s2933_s24 = sld [smem:[%s3965_s0 + %s3432_s21]]  }
  0x23   :  { %567 = vperm.xlu1 %3394, %v549_v29   ;;  %v2619_v18 = vld [vmem:[%s2938_s20] sm:$0xff]  ;;  %s2932_s20 = sld [smem:[%s3965_s0 + %s3431_s17]]  }
  0x24   :  { %v1272_v19 = vld [vmem:[%s2925_s28] sm:$0xf]  ;;  %s2913_s28 = sld [smem:[%s3965_s0 + %s3433_s25]]  }
  0x26   :  { %562 = vperm.xlu0 %3393, %v548_v26  }
  0x27   :  { %557 = vperm.xlu1 %3394, %v547_v31  }
  0x2a   :  { %938 = vperm.xlu0 %3393, %v900_v28  }
  0x2b   :  { %933 = vperm.xlu1 %3394, %v899_v33  }
  0x2e   :  { %928 = vperm.xlu0 %3393, %v898_v30  }
  0x2f   :  { %923 = vperm.xlu1 %3394, %v897_v35  }
  0x32   :  { %918 = vperm.xlu0 %3393, %v896_v32  }
  0x33   :  { %913 = vperm.xlu1 %3394, %v895_v37   ;;  %v347_v37 = vld [vmem:[%s3511_s29 + $0x10] sm:$0xff] }
  0x36   :  { %908 = vperm.xlu0 %3393, %v894_v34  }
  0x37   :  { %903 = vperm.xlu1 %3394, %v893_v39   ;;  %v349_v39 = vld [vmem:[%s3511_s29 + $0x20] sm:$0xff] }
  0x3a   :  { %1131 = vperm.xlu0 %3393, %v1093_v36   ;;  %v346_v36 = vld [vmem:[%s3511_s29 + $0x8] sm:$0xff] }
  0x3b   :  { %1126 = vperm.xlu1 %3394, %v1092_v41   ;;  %v351_v41 = vld [vmem:[%s3511_s29 + $0x30] sm:$0xff] }
  0x3e   :  { %1121 = vperm.xlu0 %3393, %v1091_v38   ;;  %v348_v38 = vld [vmem:[%s3511_s29 + $0x18] sm:$0xff] }
  0x3f   :  { %1116 = vperm.xlu1 %3394, %v1090_v44  }
  0x42   :  { %1111 = vperm.xlu0 %3393, %v1089_v40   ;;  %v350_v40 = vld [vmem:[%s3511_s29 + $0x28] sm:$0xff]  ;;  %s3418_s29 = smov 6  }
  0x43   :  { %1106 = vperm.xlu1 %3394, %v1088_v45   ;;  %s3625_s6 = sld [smem:[%s3965_s0 + %s3418_s29]]  }
  0x46   :  { %1101 = vperm.xlu0 %3393, %v1087_v43   ;;  %v539_v43 = vld [vmem:[%s3591_s3] sm:$0xff] }
  0x47   :  { %1096 = vperm.xlu1 %3394, %v1086_v48  }
  0x4a   :  { %1656 = vperm.xlu0 %3393, %v1618_v46  }
  0x4b   :  { %1651 = vperm.xlu1 %3394, %v1617_v50  }
  0x4e   :  { %1646 = vperm.xlu0 %3393, %v1616_v47  }
  0x4f   :  { %1641 = vperm.xlu1 %3394, %v1615_v52  }
  0x52   :  { %1636 = vperm.xlu0 %3393, %v1614_v49  }
  0x53   :  { %1631 = vperm.xlu1 %3394, %v1613_v54  }
  0x56   :  { %1626 = vperm.xlu0 %3393, %v1612_v51  }
  0x57   :  { %1621 = vperm.xlu1 %3394, %v1611_v56  }
  0x5a   :  { %1865 = vperm.xlu0 %3393, %v1827_v53  }
  0x5b   :  { %1860 = vperm.xlu1 %3394, %v1826_v58  }
  0x5e   :  { %1855 = vperm.xlu0 %3393, %v1825_v55  }
  0x5f   :  { %1850 = vperm.xlu1 %3394, %v1824_v60  }
  0x62   :  { %1845 = vperm.xlu0 %3393, %v1823_v57  }
  0x63   :  { %1840 = vperm.xlu1 %3394, %v1822_v62  }
  0x66   :  { %1835 = vperm.xlu0 %3393, %v1821_v59  }
  0x67   :  { %1830 = vperm.xlu1 %3394, %v1820_v0  }
  0x6a   :  { %2251 = vperm.xlu0 %3393, %v2213_v61  }
  0x6b   :  { %2246 = vperm.xlu1 %3394, %v2212_v2  }
  0x6e   :  { %2241 = vperm.xlu0 %3393, %v2211_v63  }
  0x6f   :  { %2236 = vperm.xlu1 %3394, %v2210_v4  }
  0x72   :  { %2231 = vperm.xlu0 %3393, %v2209_v1  }
  0x73   :  { %2226 = vperm.xlu1 %3394, %v2208_v6  }
  0x76   :  { %2221 = vperm.xlu0 %3393, %v2207_v3  }
  0x77   :  { %2216 = vperm.xlu1 %3394, %v2206_v8  }
  0x7a   :  { %2460 = vperm.xlu0 %3393, %v2422_v5  }
  0x7b   :  { %2455 = vperm.xlu1 %3394, %v2421_v10  }
  0x7e   :  { %2450 = vperm.xlu0 %3393, %v2420_v7  }
  0x7f   :  { %2445 = vperm.xlu1 %3394, %v2419_v12   ;;  %v540_v12 = vld [vmem:[%s3591_s3 + $0x8] sm:$0xff] }
  0x82   :  { %2440 = vperm.xlu0 %3393, %v2418_v9  }
  0x83   :  { %2435 = vperm.xlu1 %3394, %v2417_v14   ;;  %v542_v14 = vld [vmem:[%s3591_s3 + $0x18] sm:$0xff] }
  0x85   :  { %v399_v46 = vpop.permute.xlu0 %398 }
  0x86   :  { %2430 = vperm.xlu0 %3393, %v2416_v11   ;;  %v389_v48 = vpop.permute.xlu1 %388 }
  0x87   :  { %2425 = vperm.xlu1 %3394, %v2415_v16   ;;  %v544_v16 = vld [vmem:[%s3591_s3 + $0x28] sm:$0xff] }
  0x89   :  { %v394_v51 = vpop.permute.xlu0 %393 }
  0x8a   :  { %2629 = vperm.xlu0 %3393, %v2620_v13   ;;  %v384_v53 = vpop.permute.xlu1 %383  ;;  %v541_v13 = vld [vmem:[%s3591_s3 + $0x10] sm:$0xff] }
  0x8b   :  { %2624 = vperm.xlu1 %3394, %v2619_v18   ;;  %v546_v18 = vld [vmem:[%s3591_s3 + $0x38] sm:$0xff] }
  0x8d   :  { %v379_v60 = vpop.permute.xlu0 %378 }
  0x8e   :  { %2634 = vperm.xlu0 %3393, %v2621_v15   ;;  %v374_v63 = vpop.permute.xlu1 %373  ;;  %v543_v15 = vld [vmem:[%s3591_s3 + $0x20] sm:$0xff] }
  0x8f   :  { %1275 = vperm.xlu1 %3394, %v1272_v19   ;;  %v135_v19 = vld [vmem:[%s3446_s9 + $0x40] sm:$0xff] }
  0x90   :  { %3190 = vmatprep.mubr.msk.f32.mxu0 %vm143_vm0, %v135_v19 }
  0x91   :  { %v369_v4 = vpop.permute.xlu0 %368 }
  0x92   :  { %2739 = vperm.xlu0 %3393, %v2736_v17   ;;  %v364_v7 = vpop.permute.xlu1 %363  ;;  %v545_v17 = vld [vmem:[%s3591_s3 + $0x30] sm:$0xff]  ;;  %s3952_s3 = sld [smem:[%s3965_s0 + %s3434_s30]]  }
  0xd2   :  { %v3180_v20 = vpop.f32.mrf.mxu0 }
  0xd3   :  { %v338_v34 = vmax.f32 %v3180_v20, 0.0  ;;  %v136_v20 = vld [vmem:[%s3446_s9 + $0x48] sm:$0xff] }
  0xd4   :  { %v258_v21 = vpop.f32.mrf.mxu0  ;;  %3191 = vmatmul.mubr.msk.f32.gmra.mxu0 %vm143_vm0, %v136_v20 }
  0xd5   :  { %v337_v35 = vmax.f32 %v258_v21, 0.0  ;;  %v137_v21 = vld [vmem:[%s3446_s9 + $0x50] sm:$0xff] }
  0xd6   :  { %v3183_v22 = vpop.f32.mrf.mxu0  ;;  %3193 = vmatprep.mubr.msk.f32.mxu0 %vm143_vm0, %v137_v21 }
  0xd7   :  { %v340_v32 = vmax.f32 %v3183_v22, 0.0  ;;  %v138_v22 = vld [vmem:[%s3446_s9 + $0x58] sm:$0xff] }
  0xd8   :  { %v268_v23 = vpop.f32.mrf.mxu0  ;;  %3194 = vmatmul.mubr.msk.f32.gmra.mxu0 %vm143_vm0, %v138_v22 }
  0xd9   :  { %v339_v33 = vmax.f32 %v268_v23, 0.0  ;;  %v139_v23 = vld [vmem:[%s3446_s9 + $0x60] sm:$0xff] }
  0xda   :  { %v3186_v24 = vpop.f32.mrf.mxu0  ;;  %3196 = vmatprep.mubr.msk.f32.mxu0 %vm143_vm0, %v139_v23 }
  0xdb   :  { %v342_v30 = vmax.f32 %v3186_v24, 0.0  ;;  %v140_v24 = vld [vmem:[%s3446_s9 + $0x68] sm:$0xff] }
  0xdc   :  { %v278_v25 = vpop.f32.mrf.mxu0  ;;  %3197 = vmatmul.mubr.msk.f32.gmra.mxu0 %vm143_vm0, %v140_v24 }
  0xdd   :  { %v341_v31 = vmax.f32 %v278_v25, 0.0  ;;  %v141_v25 = vld [vmem:[%s3446_s9 + $0x70] sm:$0xff] }
  0xde   :  { %v3189_v26 = vpop.f32.mrf.mxu0  ;;  %3199 = vmatprep.mubr.msk.f32.mxu0 %vm143_vm0, %v141_v25 }
  0xdf   :  { %v344_v27 = vmax.f32 %v3189_v26, 0.0  ;;  %v142_v26 = vld [vmem:[%s3446_s9 + $0x78] sm:$0xff]  ;;  %s3419_s9 = smov 7  }
  0xe0   :  { %v288_v28 = vpop.f32.mrf.mxu0  ;;  %3200 = vmatmul.mubr.msk.f32.gmra.mxu0 %vm143_vm0, %v142_v26  ;;  %s3649_s10 = sld [smem:[%s3965_s0 + %s3419_s9]]  }
  0xe1   :  { %v343_v29 = vmax.f32 %v288_v28, 0.0  ;;  %3202 = vmatprep.subr.mxu1 %v344_v27 }
  0xe2   :  { %3203 = vmatpush3.msra.mxu1 %v344_v27  ;;  %v732_v27 = vld [vmem:[%s3625_s6] sm:$0xff] }
  0xe3   :  { %3204 = vmatprep.subr.mxu1 %v343_v29  ;;  %3274 = vmatprep.mubr.msk.f32.mxu0 %vm401_vm1, %v732_v27 }
  0xe4   :  { %3205 = vmatpush3.msra.mxu1 %v343_v29 }
  0xe5   :  { %3206 = vmatprep.subr.mxu1 %v342_v30 }
  0xe6   :  { %3207 = vmatpush3.msra.mxu1 %v342_v30  ;;  %v593_v30 = vpop.permute.xlu0 %592 }
  0xe7   :  { %3208 = vmatprep.subr.mxu1 %v341_v31 }
  0xe8   :  { %3209 = vmatpush3.msra.mxu1 %v341_v31 }
  0xe9   :  { %3210 = vmatprep.subr.mxu1 %v340_v32 }
  0xea   :  { %3211 = vmatpush3.msra.mxu1 %v340_v32  ;;  %v588_v32 = vpop.permute.xlu1 %587 }
  0xeb   :  { %3212 = vmatprep.subr.mxu1 %v339_v33 }
  0xec   :  { %3213 = vmatpush3.msra.mxu1 %v339_v33 }
  0xed   :  { %3214 = vmatprep.subr.mxu1 %v338_v34 }
  0xee   :  { %3215 = vmatpush3.msra.mxu1 %v338_v34 }
  0xef   :  { %3216 = vmatprep.subr.mxu1 %v337_v35 }
  0xf0   :  { %3217 = vmatpush3.msra.mxu1 %v337_v35  ;;  %v583_v35 = vpop.permute.xlu0 %582 }
  0xf1   :  { %3219 = vmatmul.mubr.msk.f32.vlgmr.msra.gmra.mxu1 %vm401_vm1, %v346_v36 }
  0xf2   :  { %3221 = vmatprep.mubr.msk.f32.mxu1 %vm401_vm1, %v347_v37  ;;  %v578_v37 = vpop.permute.xlu1 %577 }
  0xf5   :  { %3222 = vmatmul.mubr.msk.f32.gmra.mxu1 %vm401_vm1, %v348_v38 }
  0xf6   :  { %3224 = vmatprep.mubr.msk.f32.mxu1 %vm401_vm1, %v349_v39 }
  0xf9   :  { %3225 = vmatmul.mubr.msk.f32.gmra.mxu1 %vm401_vm1, %v350_v40 }
  0xfa   :  { %3227 = vmatprep.mubr.msk.f32.mxu1 %vm401_vm1, %v351_v41 }
  0xfd   :  { %3228 = vmatmul.mubr.msk.f32.gmra.mxu1 %vm401_vm1, %v352_v42 }
  0xfe   :  { %3246 = vmatprep.mubr.msk.f32.mxu1 %vm401_vm1, %v539_v43 }
 0x1b1   :  { %v3220_v44 = vpop.f32.mrf.mxu1 }
 0x1b2   :  { %v498_v5 = vadd.f32 %v3220_v44, %v369_v4  ;;  %v573_v44 = vpop.permute.xlu0 %572  ;;  %v3192_v4 = vpop.f32.mrf.mxu0 }
 0x1b3   :  { %v492_v45 = vpop.f32.mrf.mxu1 }
 0x1b4   :  { %v493_v8 = vadd.f32 %v492_v45, %v364_v7  ;;  %v532_v10 = vmax.f32 %v498_v5, 0.0  ;;  %v298_v5 = vpop.f32.mrf.mxu0 }
 0x1b5   :  { %v3223_v47 = vpop.f32.mrf.mxu1 }
 0x1b6   :  { %v508_v0 = vadd.f32 %v3223_v47, %v379_v60  ;;  %v531_v11 = vmax.f32 %v493_v8, 0.0  ;;  %v568_v47 = vpop.permute.xlu1 %567  ;;  %v733_v60 = vld [vmem:[%s3625_s6 + $0x8] sm:$0xff] }
 0x1b7   :  { %v502_v49 = vpop.f32.mrf.mxu1 }
 0x1b8   :  { %v503_v2 = vadd.f32 %v502_v49, %v374_v63  ;;  %v534_v6 = vmax.f32 %v508_v0, 0.0  ;;  %v736_v63 = vld [vmem:[%s3625_s6 + $0x20] sm:$0xff]  ;;  %v737_v0 = vld [vmem:[%s3625_s6 + $0x28] sm:$0xff] }
 0x1b9   :  { %v3226_v50 = vpop.f32.mrf.mxu1 }
 0x1ba   :  { %v518_v57 = vadd.f32 %v3226_v50, %v389_v48  ;;  %v533_v9 = vmax.f32 %v503_v2, 0.0  ;;  %v739_v2 = vld [vmem:[%s3625_s6 + $0x38] sm:$0xff] }
 0x1bb   :  { %v512_v52 = vpop.f32.mrf.mxu1 }
 0x1bc   :  { %v513_v61 = vadd.f32 %v512_v52, %v384_v53  ;;  %v536_v1 = vmax.f32 %v518_v57, 0.0  ;;  %v563_v52 = vpop.permute.xlu0 %562 }
 0x1bd   :  { %v3229_v54 = vpop.f32.mrf.mxu1 }
 0x1be   :  { %v528_v55 = vadd.f32 %v3229_v54, %v399_v46  ;;  %v535_v3 = vmax.f32 %v513_v61, 0.0  ;;  %v734_v61 = vld [vmem:[%s3625_s6 + $0x10] sm:$0xff] }
 0x1bf   :  { %v522_v56 = vpop.f32.mrf.mxu1 }
 0x1c0   :  { %v538_v58 = vmax.f32 %v528_v55, 0.0  ;;  %v523_v59 = vadd.f32 %v522_v56, %v394_v51  ;;  %v558_v55 = vpop.permute.xlu1 %557 }
 0x1c2   :  { %v537_v62 = vmax.f32 %v523_v59, 0.0  ;;  %3230 = vmatprep.subr.mxu1 %v538_v58 }
 0x1c3   :  { %3231 = vmatpush3.msra.mxu1 %v538_v58 }
 0x1c4   :  { %3232 = vmatprep.subr.mxu1 %v537_v62 }
 0x1c5   :  { %3233 = vmatpush3.msra.mxu1 %v537_v62  ;;  %v735_v62 = vld [vmem:[%s3625_s6 + $0x18] sm:$0xff] }
 0x1c6   :  { %3234 = vmatprep.subr.mxu1 %v536_v1 }
 0x1c7   :  { %3235 = vmatpush3.msra.mxu1 %v536_v1  ;;  %v738_v1 = vld [vmem:[%s3625_s6 + $0x30] sm:$0xff] }
 0x1c8   :  { %3236 = vmatprep.subr.mxu1 %v535_v3 }
 0x1c9   :  { %3237 = vmatpush3.msra.mxu1 %v535_v3  ;;  %v885_v3 = vld [vmem:[%s3649_s10] sm:$0xff] }
 0x1ca   :  { %3238 = vmatprep.subr.mxu1 %v534_v6 }
 0x1cb   :  { %3239 = vmatpush3.msra.mxu1 %v534_v6  ;;  %v3195_v6 = vpop.f32.mrf.mxu0 }
 0x1cc   :  { %3240 = vmatprep.subr.mxu1 %v533_v9 }
 0x1cd   :  { %3241 = vmatpush3.msra.mxu1 %v533_v9  ;;  %v308_v7 = vpop.f32.mrf.mxu0 }
 0x1ce   :  { %3242 = vmatprep.subr.mxu1 %v532_v10 }
 0x1cf   :  { %3243 = vmatpush3.msra.mxu1 %v532_v10  ;;  %v3198_v8 = vpop.f32.mrf.mxu0 }
 0x1d0   :  { %3244 = vmatprep.subr.mxu1 %v531_v11 }
 0x1d1   :  { %3245 = vmatpush3.msra.mxu1 %v531_v11  ;;  %v318_v9 = vpop.f32.mrf.mxu0 }
 0x1d2   :  { %3247 = vmatmul.mubr.msk.f32.vlgmr.msra.gmra.mxu1 %vm401_vm1, %v540_v12 }
 0x1d3   :  { %3249 = vmatprep.mubr.msk.f32.mxu1 %vm401_vm1, %v541_v13  ;;  %v3201_v10 = vpop.f32.mrf.mxu0 }
 0x1d5   :  { %v328_v11 = vpop.f32.mrf.mxu0 }
 0x1d6   :  { %3250 = vmatmul.mubr.msk.f32.gmra.mxu1 %vm401_vm1, %v542_v14 }
 0x1d7   :  { %3252 = vmatprep.mubr.msk.f32.mxu1 %vm401_vm1, %v543_v15 }
 0x1da   :  { %3253 = vmatmul.mubr.msk.f32.gmra.mxu1 %vm401_vm1, %v544_v16 }
 0x1db   :  { %3255 = vmatprep.mubr.msk.f32.mxu1 %vm401_vm1, %v545_v17 }
 0x1de   :  { %3256 = vmatmul.mubr.msk.f32.gmra.mxu1 %vm401_vm1, %v546_v18 }
 0x1df   :  { %3302 = vmatprep.mubr.msk.f32.mxu1 %vm401_vm1, %v885_v3 }
 0x292   :  { %v3248_v28 = vpop.f32.mrf.mxu1 }
 0x293   :  { %v691_v53 = vadd.f32 %v3248_v28, %v563_v52 }
 0x294   :  { %v685_v29 = vpop.f32.mrf.mxu1 }
 0x295   :  { %v686_v56 = vadd.f32 %v685_v29, %v558_v55  ;;  %v725_v58 = vmax.f32 %v691_v53, 0.0 }
 0x296   :  { %v3251_v31 = vpop.f32.mrf.mxu1 }
 0x297   :  { %v701_v48 = vadd.f32 %v3251_v31, %v573_v44  ;;  %v724_v59 = vmax.f32 %v686_v56, 0.0  ;;  %v3421_v44 = vmov 0.0  }
 0x298   :  { %v695_v33 = vpop.f32.mrf.mxu1 }
 0x299   :  { %v696_v50 = vadd.f32 %v695_v33, %v568_v47  ;;  %v727_v54 = vmax.f32 %v701_v48, 0.0  ;;  %v939_v47 = vpop.permute.xlu0 %938 }
 0x29a   :  { %v3254_v34 = vpop.f32.mrf.mxu1 }
 0x29b   :  { %v711_v41 = vadd.f32 %v3254_v34, %v583_v35  ;;  %v726_v57 = vmax.f32 %v696_v50, 0.0 }
 0x29c   :  { %v705_v36 = vpop.f32.mrf.mxu1 }
 0x29d   :  { %v706_v45 = vadd.f32 %v705_v36, %v578_v37  ;;  %v729_v49 = vmax.f32 %v711_v41, 0.0  ;;  %v886_v36 = vld [vmem:[%s3649_s10 + $0x8] sm:$0xff]  ;;  %v887_v37 = vld [vmem:[%s3649_s10 + $0x10] sm:$0xff]  ;;  %v929_v52 = vpop.permute.xlu0 %928 }
 0x29e   :  { %v3257_v38 = vpop.f32.mrf.mxu1  ;;  %v891_v41 = vld [vmem:[%s3649_s10 + $0x30] sm:$0xff] }
 0x29f   :  { %v721_v39 = vadd.f32 %v3257_v38, %v593_v30  ;;  %v728_v51 = vmax.f32 %v706_v45, 0.0  ;;  %v888_v38 = vld [vmem:[%s3649_s10 + $0x18] sm:$0xff] }
 0x2a0   :  { %v715_v40 = vpop.f32.mrf.mxu1 }
 0x2a1   :  { %v731_v42 = vmax.f32 %v721_v39, 0.0  ;;  %v716_v43 = vadd.f32 %v715_v40, %v588_v32  ;;  %v889_v39 = vld [vmem:[%s3649_s10 + $0x20] sm:$0xff]  ;;  %v890_v40 = vld [vmem:[%s3649_s10 + $0x28] sm:$0xff] }
 0x2a3   :  { %v730_v46 = vmax.f32 %v716_v43, 0.0  ;;  %3258 = vmatprep.subr.mxu0 %v731_v42  ;;  %v1078_v43 = vld [vmem:[%s3670_s14] sm:$0xff] }
 0x2a4   :  { %3259 = vmatpush3.msra.mxu0 %v731_v42  ;;  %v892_v42 = vld [vmem:[%s3649_s10 + $0x38] sm:$0xff] }
 0x2a5   :  { %3260 = vmatprep.subr.mxu0 %v730_v46 }
 0x2a6   :  { %3261 = vmatpush3.msra.mxu0 %v730_v46 }
 0x2a7   :  { %3262 = vmatprep.subr.mxu0 %v729_v49 }
 0x2a8   :  { %3263 = vmatpush3.msra.mxu0 %v729_v49  ;;  %v934_v49 = vpop.permute.xlu1 %933 }
 0x2a9   :  { %3264 = vmatprep.subr.mxu0 %v728_v51 }
 0x2aa   :  { %3265 = vmatpush3.msra.mxu0 %v728_v51 }
 0x2ab   :  { %3266 = vmatprep.subr.mxu0 %v727_v54 }
 0x2ac   :  { %3267 = vmatpush3.msra.mxu0 %v727_v54  ;;  %v924_v54 = vpop.permute.xlu1 %923 }
 0x2ad   :  { %3268 = vmatprep.subr.mxu0 %v726_v57 }
 0x2ae   :  { %3269 = vmatpush3.msra.mxu0 %v726_v57 }
 0x2af   :  { %3270 = vmatprep.subr.mxu0 %v725_v58 }
 0x2b0   :  { %3271 = vmatpush3.msra.mxu0 %v725_v58 }
 0x2b1   :  { %3272 = vmatprep.subr.mxu0 %v724_v59 }
 0x2b2   :  { %3273 = vmatpush3.msra.mxu0 %v724_v59 }
 0x2b3   :  { %3275 = vmatmul.mubr.msk.f32.vlgmr.msra.gmra.mxu0 %vm401_vm1, %v733_v60 }
 0x2b4   :  { %3277 = vmatprep.mubr.msk.f32.mxu0 %vm401_vm1, %v734_v61  ;;  %v919_v61 = vpop.permute.xlu0 %918 }
 0x2b7   :  { %3278 = vmatmul.mubr.msk.f32.gmra.mxu0 %vm401_vm1, %v735_v62 }
 0x2b8   :  { %3280 = vmatprep.mubr.msk.f32.mxu0 %vm401_vm1, %v736_v63 }
 0x2bb   :  { %3281 = vmatmul.mubr.msk.f32.gmra.mxu0 %vm401_vm1, %v737_v0  ;;  %v914_v0 = vpop.permute.xlu1 %913 }
 0x2bc   :  { %3283 = vmatprep.mubr.msk.f32.mxu0 %vm401_vm1, %v738_v1 }
 0x2bf   :  { %3284 = vmatmul.mubr.msk.f32.gmra.mxu0 %vm401_vm1, %v739_v2 }
 0x2c0   :  { %3330 = vmatprep.mubr.msk.f32.mxu0 %vm401_vm1, %v1078_v43 }
 0x373   :  { %v3276_v12 = vpop.f32.mrf.mxu0 }
 0x374   :  { %v870_v30 = vadd.f32 %v3276_v12, %v3192_v4 }
 0x375   :  { %v830_v13 = vpop.f32.mrf.mxu0 }
 0x376   :  { %v869_v32 = vadd.f32 %v830_v13, %v298_v5  ;;  %v878_v34 = vmax.f32 %v870_v30, 0.0  ;;  %v909_v5 = vpop.permute.xlu0 %908  ;;  %v1079_v13 = vld [vmem:[%s3670_s14 + $0x8] sm:$0xff]  ;;  %v1362_v30 = vld [vmem:[%s3701_s22] sm:$0xff] }
 0x377   :  { %v3279_v14 = vpop.f32.mrf.mxu0 }
 0x378   :  { %v872_v26 = vadd.f32 %v3279_v14, %v3195_v6  ;;  %v877_v35 = vmax.f32 %v869_v32, 0.0  ;;  %v1361_v14 = vld [vmem:[%s3678_s18 + $0x48] sm:$0xff]  ;;  %v1364_v32 = vld [vmem:[%s3701_s22 + $0x10] sm:$0xff] }
 0x379   :  { %v840_v15 = vpop.f32.mrf.mxu0 }
 0x37a   :  { %v871_v28 = vadd.f32 %v840_v15, %v308_v7  ;;  %v880_v31 = vmax.f32 %v872_v26, 0.0  ;;  %v1080_v15 = vld [vmem:[%s3670_s14 + $0x10] sm:$0xff]  ;;  %v1353_v26 = vld [vmem:[%s3678_s18 + $0x8] sm:$0xff] }
 0x37b   :  { %v3282_v16 = vpop.f32.mrf.mxu0 }
 0x37c   :  { %v874_v21 = vadd.f32 %v3282_v16, %v3198_v8  ;;  %v879_v33 = vmax.f32 %v871_v28, 0.0  ;;  %v904_v8 = vpop.permute.xlu1 %903  ;;  %v1360_v16 = vld [vmem:[%s3678_s18 + $0x40] sm:$0xff] }
 0x37d   :  { %v850_v17 = vpop.f32.mrf.mxu0  ;;  %v1352_v28 = vld [vmem:[%s3678_s18] sm:$0xff] }
 0x37e   :  { %v873_v24 = vadd.f32 %v850_v17, %v318_v9  ;;  %v882_v27 = vmax.f32 %v874_v21, 0.0  ;;  %v1359_v17 = vld [vmem:[%s3678_s18 + $0x38] sm:$0xff]  ;;  %v1082_v21 = vld [vmem:[%s3670_s14 + $0x20] sm:$0xff] }
 0x37f   :  { %v3285_v18 = vpop.f32.mrf.mxu0 }
 0x380   :  { %v876_v19 = vadd.f32 %v3285_v18, %v3201_v10  ;;  %v881_v29 = vmax.f32 %v873_v24, 0.0  ;;  %v1358_v18 = vld [vmem:[%s3678_s18 + $0x30] sm:$0xff] }
 0x381   :  { %v860_v20 = vpop.f32.mrf.mxu0  ;;  %v1354_v24 = vld [vmem:[%s3678_s18 + $0x10] sm:$0xff] }
 0x382   :  { %v884_v22 = vmax.f32 %v876_v19, 0.0  ;;  %v875_v23 = vadd.f32 %v860_v20, %v328_v11  ;;  %v1081_v19 = vld [vmem:[%s3670_s14 + $0x18] sm:$0xff]  ;;  %v1357_v20 = vld [vmem:[%s3678_s18 + $0x28] sm:$0xff] }
 0x384   :  { %v883_v25 = vmax.f32 %v875_v23, 0.0  ;;  %3286 = vmatprep.subr.mxu1 %v884_v22  ;;  %v1355_v23 = vld [vmem:[%s3678_s18 + $0x18] sm:$0xff] }
 0x385   :  { %3287 = vmatpush3.msra.mxu1 %v884_v22  ;;  %v1356_v22 = vld [vmem:[%s3678_s18 + $0x20] sm:$0xff] }
 0x386   :  { %3288 = vmatprep.subr.mxu1 %v883_v25 }
 0x387   :  { %3289 = vmatpush3.msra.mxu1 %v883_v25  ;;  %v1083_v25 = vld [vmem:[%s3670_s14 + $0x28] sm:$0xff] }
 0x388   :  { %3290 = vmatprep.subr.mxu1 %v882_v27 }
 0x389   :  { %3291 = vmatpush3.msra.mxu1 %v882_v27  ;;  %v1084_v27 = vld [vmem:[%s3670_s14 + $0x30] sm:$0xff] }
 0x38a   :  { %3292 = vmatprep.subr.mxu1 %v881_v29 }
 0x38b   :  { %3293 = vmatpush3.msra.mxu1 %v881_v29  ;;  %v1085_v29 = vld [vmem:[%s3670_s14 + $0x38] sm:$0xff] }
 0x38c   :  { %3294 = vmatprep.subr.mxu1 %v880_v31 }
 0x38d   :  { %3295 = vmatpush3.msra.mxu1 %v880_v31  ;;  %v1363_v31 = vld [vmem:[%s3701_s22 + $0x8] sm:$0xff] }
 0x38e   :  { %3296 = vmatprep.subr.mxu1 %v879_v33 }
 0x38f   :  { %3297 = vmatpush3.msra.mxu1 %v879_v33  ;;  %v1365_v33 = vld [vmem:[%s3701_s22 + $0x18] sm:$0xff] }
 0x390   :  { %3298 = vmatprep.subr.mxu1 %v878_v34 }
 0x391   :  { %3299 = vmatpush3.msra.mxu1 %v878_v34  ;;  %v1366_v34 = vld [vmem:[%s3701_s22 + $0x20] sm:$0xff] }
 0x392   :  { %3300 = vmatprep.subr.mxu1 %v877_v35 }
 0x393   :  { %3301 = vmatpush3.msra.mxu1 %v877_v35  ;;  %v1367_v35 = vld [vmem:[%s3701_s22 + $0x28] sm:$0xff] }
 0x394   :  { %3303 = vmatmul.mubr.msk.f32.vlgmr.msra.gmra.mxu1 %vm401_vm1, %v886_v36  ;;  %3342 = vmatprep.subr.mxu1 %v3421_v44  ;;  %v1368_v36 = vld [vmem:[%s3701_s22 + $0x30] sm:$0xff] }
 0x395   :  { %3305 = vmatprep.mubr.msk.f32.mxu1 %vm401_vm1, %v887_v37  ;;  %v1369_v37 = vld [vmem:[%s3701_s22 + $0x38] sm:$0xff] }
 0x398   :  { %3306 = vmatmul.mubr.msk.f32.gmra.mxu1 %vm401_vm1, %v888_v38 }
 0x399   :  { %3308 = vmatprep.mubr.msk.f32.mxu1 %vm401_vm1, %v889_v39 }
 0x39c   :  { %3309 = vmatmul.mubr.msk.f32.gmra.mxu1 %vm401_vm1, %v890_v40  ;;  %v1132_v40 = vpop.permute.xlu0 %1131 }
 0x39d   :  { %3311 = vmatprep.mubr.msk.f32.mxu1 %vm401_vm1, %v891_v41 }
 0x3a0   :  { %3312 = vmatmul.mubr.msk.f32.gmra.mxu1 %vm401_vm1, %v892_v42  ;;  %v1127_v42 = vpop.permute.xlu1 %1126 }
 0x3a1   :  { %3358 = vmatprep.mubr.msk.f32.mxu1 %vm3424_vm2, %v3421_v44 }
 0x454   :  { %v3304_v45 = vpop.f32.mrf.mxu1 }
 0x455   :  { %v1037_v6 = vadd.f32 %v3304_v45, %v909_v5 }
 0x456   :  { %v1031_v46 = vpop.f32.mrf.mxu1 }
 0x457   :  { %v1032_v9 = vadd.f32 %v1031_v46, %v904_v8  ;;  %v1071_v11 = vmax.f32 %v1037_v6, 0.0  ;;  %v1122_v46 = vpop.permute.xlu0 %1121 }
 0x458   :  { %v3307_v48 = vpop.f32.mrf.mxu1 }
 0x459   :  { %v1047_v1 = vadd.f32 %v3307_v48, %v919_v61  ;;  %v1070_v12 = vmax.f32 %v1032_v9, 0.0  ;;  %v1117_v48 = vpop.permute.xlu1 %1116 }
 0x45a   :  { %v1041_v50 = vpop.f32.mrf.mxu1 }
 0x45b   :  { %v1042_v3 = vadd.f32 %v1041_v50, %v914_v0  ;;  %v1073_v7 = vmax.f32 %v1047_v1, 0.0 }
 0x45c   :  { %v3310_v51 = vpop.f32.mrf.mxu1 }
 0x45d   :  { %v1057_v58 = vadd.f32 %v3310_v51, %v929_v52  ;;  %v1072_v10 = vmax.f32 %v1042_v3, 0.0 }
 0x45e   :  { %v1051_v53 = vpop.f32.mrf.mxu1 }
 0x45f   :  { %v1052_v62 = vadd.f32 %v1051_v53, %v924_v54  ;;  %v1075_v2 = vmax.f32 %v1057_v58, 0.0 }
 0x460   :  { %v3313_v55 = vpop.f32.mrf.mxu1 }
 0x461   :  { %v1067_v56 = vadd.f32 %v3313_v55, %v939_v47  ;;  %v1074_v4 = vmax.f32 %v1052_v62, 0.0  ;;  %v1112_v55 = vpop.permute.xlu0 %1111 }
 0x462   :  { %v1061_v57 = vpop.f32.mrf.mxu1 }
 0x463   :  { %v1077_v59 = vmax.f32 %v1067_v56, 0.0  ;;  %v1062_v60 = vadd.f32 %v1061_v57, %v934_v49 }
 0x465   :  { %v1076_v63 = vmax.f32 %v1062_v60, 0.0  ;;  %3314 = vmatprep.subr.mxu0 %v1077_v59 }
 0x466   :  { %3315 = vmatpush3.msra.mxu0 %v1077_v59  ;;  %v1107_v59 = vpop.permute.xlu1 %1106 }
 0x467   :  { %3316 = vmatprep.subr.mxu0 %v1076_v63 }
 0x468   :  { %3317 = vmatpush3.msra.mxu0 %v1076_v63 }
 0x469   :  { %3318 = vmatprep.subr.mxu0 %v1075_v2 }
 0x46a   :  { %3319 = vmatpush3.msra.mxu0 %v1075_v2  ;;  %v1102_v2 = vpop.permute.xlu0 %1101  ;;  %v1097_v6 = vpop.permute.xlu1 %1096 }
 0x46b   :  { %3320 = vmatprep.subr.mxu0 %v1074_v4 }
 0x46c   :  { %3321 = vmatpush3.msra.mxu0 %v1074_v4 }
 0x46d   :  { %3322 = vmatprep.subr.mxu0 %v1073_v7 }
 0x46e   :  { %3323 = vmatpush3.msra.mxu0 %v1073_v7 }
 0x46f   :  { %3324 = vmatprep.subr.mxu0 %v1072_v10 }
 0x470   :  { %3325 = vmatpush3.msra.mxu0 %v1072_v10 }
 0x471   :  { %3326 = vmatprep.subr.mxu0 %v1071_v11 }
 0x472   :  { %3327 = vmatpush3.msra.mxu0 %v1071_v11 }
 0x473   :  { %3328 = vmatprep.subr.mxu0 %v1070_v12 }
 0x474   :  { %3329 = vmatpush3.msra.mxu0 %v1070_v12 }
 0x475   :  { %3331 = vmatmul.mubr.msk.f32.vlgmr.msra.gmra.mxu0 %vm401_vm1, %v1079_v13  ;;  %1448 = vmatprep.subr.mxu0 %v1361_v14  ;;  %v1271_v14 = vld [vmem:[%s2920_s26] sm:$0xf] }
 0x476   :  { %3333 = vmatprep.mubr.msk.f32.mxu0 %vm401_vm1, %v1080_v15  ;;  %1449 = vmatpush1.msra.mxu0 %v1360_v16 }
 0x477   :  { %1450 = vmatprep.subr.mxu0 %v1359_v17 }
 0x478   :  { %1451 = vmatpush1.msra.mxu0 %v1358_v18 }
 0x479   :  { %3334 = vmatmul.mubr.msk.f32.gmra.mxu0 %vm401_vm1, %v1081_v19  ;;  %1452 = vmatprep.subr.mxu0 %v1357_v20 }
 0x47a   :  { %3336 = vmatprep.mubr.msk.f32.mxu0 %vm401_vm1, %v1082_v21  ;;  %1453 = vmatpush1.msra.mxu0 %v1356_v22 }
 0x47b   :  { %1454 = vmatprep.subr.mxu0 %v1355_v23 }
 0x47c   :  { %1455 = vmatpush1.msra.mxu0 %v1354_v24 }
 0x47d   :  { %3337 = vmatmul.mubr.msk.f32.gmra.mxu0 %vm401_vm1, %v1083_v25  ;;  %1456 = vmatprep.subr.mxu0 %v1353_v26 }
 0x47e   :  { %3339 = vmatprep.mubr.msk.f32.mxu0 %vm401_vm1, %v1084_v27  ;;  %1457 = vmatpush1.msra.mxu0 %v1352_v28 }
 0x481   :  { %3340 = vmatmul.mubr.msk.f32.gmra.mxu0 %vm401_vm1, %v1085_v29 }
 0x482   :  { %1490 = vmatprep.mubr.f32.mxu0 %v3421_v44 }
 0x485   :  { %2998 = vmatmul.mubr.msk.f32.vlgmr.msra.gmra.mxu0 %vm143_vm0, %v1362_v30 }
 0x486   :  { %1496 = vmatprep.mubr.f32.mxu0 %v3421_v44 }
 0x489   :  { %2999 = vmatmul.mubr.msk.f32.gmra.mxu0 %vm143_vm0, %v1363_v31 }
 0x48a   :  { %1502 = vmatprep.mubr.f32.mxu0 %v3421_v44 }
 0x48d   :  { %3000 = vmatmul.mubr.msk.f32.gmra.mxu0 %vm143_vm0, %v1364_v32 }
 0x48e   :  { %1508 = vmatprep.mubr.f32.mxu0 %v3421_v44 }
 0x491   :  { %3001 = vmatmul.mubr.msk.f32.gmra.mxu0 %vm143_vm0, %v1365_v33 }
 0x492   :  { %1514 = vmatprep.mubr.f32.mxu0 %v3421_v44 }
 0x495   :  { %3002 = vmatmul.mubr.msk.f32.gmra.mxu0 %vm143_vm0, %v1366_v34 }
 0x496   :  { %1520 = vmatprep.mubr.f32.mxu0 %v3421_v44 }
 0x499   :  { %3003 = vmatmul.mubr.msk.f32.gmra.mxu0 %vm143_vm0, %v1367_v35 }
 0x49a   :  { %1526 = vmatprep.mubr.f32.mxu0 %v3421_v44 }
 0x49d   :  { %3004 = vmatmul.mubr.msk.f32.gmra.mxu0 %vm143_vm0, %v1368_v36 }
 0x49e   :  { %1532 = vmatprep.mubr.f32.mxu0 %v3421_v44 }
 0x4a1   :  { %3005 = vmatmul.mubr.msk.f32.gmra.mxu0 %vm143_vm0, %v1369_v37 }
 0x4a2   :  { %1538 = vmatprep.mubr.f32.mxu0 %v3421_v44 }
 0x535   :  { %v3332_v38 = vpop.f32.mrf.mxu0 }
 0x536   :  { %v1230_v4 = vadd.f32 %v3332_v38, %v1102_v2 }
 0x537   :  { %v1224_v39 = vpop.f32.mrf.mxu0 }
 0x538   :  { %v1225_v8 = vadd.f32 %v1224_v39, %v1097_v6  ;;  %v1264_v11 = vmax.f32 %v1230_v4, 0.0 }
 0x539   :  { %v3335_v41 = vpop.f32.mrf.mxu0 }
 0x53a   :  { %v1240_v61 = vadd.f32 %v3335_v41, %v1112_v55  ;;  %v1263_v13 = vmax.f32 %v1225_v8, 0.0  ;;  %v1604_v41 = vld [vmem:[%s3756_s1 + $0x8] sm:$0xff] }
 0x53b   :  { %v1234_v43 = vpop.f32.mrf.mxu0 }
 0x53c   :  { %v1235_v0 = vadd.f32 %v1234_v43, %v1107_v59  ;;  %v1266_v5 = vmax.f32 %v1240_v61, 0.0  ;;  %v1606_v43 = vld [vmem:[%s3756_s1 + $0x18] sm:$0xff] }
 0x53d   :  { %v3338_v45 = vpop.f32.mrf.mxu0 }
 0x53e   :  { %v1250_v52 = vadd.f32 %v3338_v45, %v1122_v46  ;;  %v1265_v9 = vmax.f32 %v1235_v0, 0.0  ;;  %v1607_v45 = vld [vmem:[%s3756_s1 + $0x20] sm:$0xff]  ;;  %v1608_v46 = vld [vmem:[%s3756_s1 + $0x28] sm:$0xff]  ;;  %v1652_v0 = vpop.permute.xlu1 %1651 }
 0x53f   :  { %v1244_v47 = vpop.f32.mrf.mxu0 }
 0x540   :  { %v1245_v57 = vadd.f32 %v1244_v47, %v1117_v48  ;;  %v1268_v62 = vmax.f32 %v1250_v52, 0.0  ;;  %v1609_v47 = vld [vmem:[%s3756_s1 + $0x30] sm:$0xff]  ;;  %v1610_v48 = vld [vmem:[%s3756_s1 + $0x38] sm:$0xff] }
 0x541   :  { %v3341_v49 = vpop.f32.mrf.mxu0 }
 0x542   :  { %v1260_v50 = vadd.f32 %v3341_v49, %v1132_v40  ;;  %v1267_v1 = vmax.f32 %v1245_v57, 0.0  ;;  %v1603_v40 = vld [vmem:[%s3756_s1] sm:$0xff] }
 0x543   :  { %v1254_v51 = vpop.f32.mrf.mxu0 }
 0x544   :  { %v1270_v53 = vmax.f32 %v1260_v50, 0.0  ;;  %v1255_v54 = vadd.f32 %v1254_v51, %v1127_v42  ;;  %v1605_v42 = vld [vmem:[%s3756_s1 + $0x10] sm:$0xff] }
 0x545   :  { %v3735_v56 = vpop.f32.mrf.mxu0 }
 0x546   :  { %v1269_v58 = vmax.f32 %v1255_v54, 0.0  ;;  %3343 = vmatpush3.msra.mxu1 %v1270_v53  ;;  %v1587_v39 = vmax.f32 %v3735_v56, 0.0 }
 0x547   :  { %3344 = vmatprep.subr.mxu1 %v3421_v44  ;;  %v3738_v60 = vpop.f32.mrf.mxu0 }
 0x548   :  { %3345 = vmatpush3.msra.mxu1 %v1269_v58  ;;  %v1588_v38 = vmax.f32 %v3738_v60, 0.0 }
 0x549   :  { %3346 = vmatprep.subr.mxu1 %v3421_v44  ;;  %v3741_v63 = vpop.f32.mrf.mxu0 }
 0x54a   :  { %3347 = vmatpush3.msra.mxu1 %v1268_v62  ;;  %v1589_v37 = vmax.f32 %v3741_v63, 0.0  ;;  %v1657_v62 = vpop.permute.xlu0 %1656 }
 0x54b   :  { %3348 = vmatprep.subr.mxu1 %v3421_v44  ;;  %v1500_v3 = vpop.f32.mrf.mxu0 }
 0x54c   :  { %3349 = vmatpush3.msra.mxu1 %v1267_v1  ;;  %v1590_v36 = vmax.f32 %v1500_v3, 0.0 }
 0x54d   :  { %3350 = vmatprep.subr.mxu1 %v3421_v44  ;;  %v1504_v7 = vpop.f32.mrf.mxu0 }
 0x54e   :  { %3351 = vmatpush3.msra.mxu1 %v1266_v5  ;;  %v1591_v35 = vmax.f32 %v1504_v7, 0.0  ;;  %v1647_v3 = vpop.permute.xlu0 %1646  ;;  %v1642_v5 = vpop.permute.xlu1 %1641 }
 0x54f   :  { %3352 = vmatprep.subr.mxu1 %v3421_v44  ;;  %v1506_v10 = vpop.f32.mrf.mxu0 }
 0x550   :  { %3353 = vmatpush3.msra.mxu1 %v1265_v9  ;;  %v1592_v34 = vmax.f32 %v1506_v10, 0.0 }
 0x551   :  { %3354 = vmatprep.subr.mxu1 %v3421_v44  ;;  %v1510_v12 = vpop.f32.mrf.mxu0 }
 0x552   :  { %3355 = vmatpush3.msra.mxu1 %v1264_v11  ;;  %v1593_v33 = vmax.f32 %v1510_v12, 0.0 }
 0x553   :  { %3356 = vmatprep.subr.mxu1 %v3421_v44  ;;  %v1512_v15 = vpop.f32.mrf.mxu0 }
 0x554   :  { %3357 = vmatpush3.msra.mxu1 %v1263_v13  ;;  %v1594_v32 = vmax.f32 %v1512_v15, 0.0  ;;  %v1637_v13 = vpop.permute.xlu0 %1636 }
 0x555   :  { %3359 = vmatmul.mubr.msk.f32.vlgmr.msra.gmra.mxu1 %vm401_vm1, %v1271_v14  ;;  %v1516_v16 = vpop.f32.mrf.mxu0 }
 0x556   :  { %1747 = vmatprep.mubr.f32.mxu1 %v3421_v44  ;;  %v1595_v31 = vmax.f32 %v1516_v16, 0.0 }
 0x557   :  { %v1518_v17 = vpop.f32.mrf.mxu0 }
 0x558   :  { %v1596_v30 = vmax.f32 %v1518_v17, 0.0 }
 0x559   :  { %v1522_v18 = vpop.f32.mrf.mxu0 }
 0x55a   :  { %v1597_v29 = vmax.f32 %v1522_v18, 0.0  ;;  %v1632_v18 = vpop.permute.xlu1 %1631 }
 0x55b   :  { %v1524_v19 = vpop.f32.mrf.mxu0 }
 0x55c   :  { %v1598_v28 = vmax.f32 %v1524_v19, 0.0 }
 0x55d   :  { %v1528_v20 = vpop.f32.mrf.mxu0 }
 0x55e   :  { %v1599_v27 = vmax.f32 %v1528_v20, 0.0 }
 0x55f   :  { %v1530_v21 = vpop.f32.mrf.mxu0 }
 0x560   :  { %v1600_v26 = vmax.f32 %v1530_v21, 0.0 }
 0x561   :  { %v1534_v22 = vpop.f32.mrf.mxu0 }
 0x562   :  { %v1601_v25 = vmax.f32 %v1534_v22, 0.0 }
 0x563   :  { %v1536_v23 = vpop.f32.mrf.mxu0 }
 0x564   :  { %v1602_v24 = vmax.f32 %v1536_v23, 0.0 }
 0x566   :  { %1699 = vmatprep.subr.mxu1 %v1602_v24 }
 0x567   :  { %1700 = vmatpush1.msra.mxu1 %v1601_v25 }
 0x568   :  { %1701 = vmatprep.subr.mxu1 %v1600_v26 }
 0x569   :  { %1702 = vmatpush1.msra.mxu1 %v1599_v27  ;;  %v1627_v27 = vpop.permute.xlu0 %1626 }
 0x56a   :  { %1703 = vmatprep.subr.mxu1 %v1598_v28 }
 0x56b   :  { %1704 = vmatpush1.msra.mxu1 %v1597_v29 }
 0x56c   :  { %1705 = vmatprep.subr.mxu1 %v1596_v30 }
 0x56d   :  { %1706 = vmatpush1.msra.mxu1 %v1595_v31 }
 0x56e   :  { %1707 = vmatprep.subr.mxu1 %v1594_v32  ;;  %v1622_v32 = vpop.permute.xlu1 %1621 }
 0x56f   :  { %1708 = vmatpush1.msra.mxu1 %v1593_v33 }
 0x570   :  { %1709 = vmatprep.subr.mxu1 %v1592_v34 }
 0x571   :  { %1710 = vmatpush1.msra.mxu1 %v1591_v35 }
 0x572   :  { %1711 = vmatprep.subr.mxu1 %v1590_v36 }
 0x573   :  { %1712 = vmatpush1.msra.mxu1 %v1589_v37 }
 0x574   :  { %1713 = vmatprep.subr.mxu1 %v1588_v38 }
 0x575   :  { %1714 = vmatpush1.msra.mxu1 %v1587_v39 }
 0x576   :  { %3014 = vmatmul.mubr.msk.f32.vlgmr.msra.gmra.mxu1 %vm401_vm1, %v1603_v40 }
 0x577   :  { %1753 = vmatprep.mubr.f32.mxu1 %v3421_v44 }
 0x57a   :  { %3015 = vmatmul.mubr.msk.f32.gmra.mxu1 %vm401_vm1, %v1604_v41 }
 0x57b   :  { %1759 = vmatprep.mubr.f32.mxu1 %v3421_v44 }
 0x57e   :  { %3016 = vmatmul.mubr.msk.f32.gmra.mxu1 %vm401_vm1, %v1605_v42 }
 0x57f   :  { %1765 = vmatprep.mubr.f32.mxu1 %v3421_v44 }
 0x582   :  { %3017 = vmatmul.mubr.msk.f32.gmra.mxu1 %vm401_vm1, %v1606_v43  ;;  %v1812_v43 = vld [vmem:[%s3790_s4] sm:$0xff] }
 0x583   :  { %1771 = vmatprep.mubr.f32.mxu1 %v3421_v44 }
 0x586   :  { %3018 = vmatmul.mubr.msk.f32.gmra.mxu1 %vm401_vm1, %v1607_v45  ;;  %v1813_v45 = vld [vmem:[%s3790_s4 + $0x8] sm:$0xff] }
 0x587   :  { %1777 = vmatprep.mubr.f32.mxu1 %v3421_v44 }
 0x58a   :  { %3019 = vmatmul.mubr.msk.f32.gmra.mxu1 %vm401_vm1, %v1608_v46  ;;  %v1814_v46 = vld [vmem:[%s3790_s4 + $0x10] sm:$0xff] }
 0x58b   :  { %1783 = vmatprep.mubr.f32.mxu1 %v3421_v44 }
 0x58e   :  { %3020 = vmatmul.mubr.msk.f32.gmra.mxu1 %vm401_vm1, %v1609_v47  ;;  %v1815_v47 = vld [vmem:[%s3790_s4 + $0x18] sm:$0xff] }
 0x58f   :  { %1789 = vmatprep.mubr.f32.mxu1 %v3421_v44 }
 0x592   :  { %3021 = vmatmul.mubr.msk.f32.gmra.mxu1 %vm401_vm1, %v1610_v48  ;;  %v1816_v48 = vld [vmem:[%s3790_s4 + $0x20] sm:$0xff] }
 0x593   :  { %1956 = vmatprep.mubr.f32.mxu1 %v3421_v44 }
 0x615   :  { %v3785_v49 = vpop.f32.mrf.mxu1 }
 0x617   :  { %v3360_v50 = vpop.f32.mrf.mxu1 }
 0x618   :  { %v1817_v50 = vld [vmem:[%s3790_s4 + $0x28] sm:$0xff] }
 0x636   :  { %v1749_v51 = vpop.f32.mrf.mxu1 }
 0x637   :  { %v1750_v37 = vadd.f32 %v1749_v51, %v1622_v32  ;;  %v1818_v51 = vld [vmem:[%s3790_s4 + $0x30] sm:$0xff] }
 0x638   :  { %v1751_v52 = vpop.f32.mrf.mxu1 }
 0x639   :  { %v1752_v35 = vadd.f32 %v1751_v52, %v1622_v32  ;;  %v1796_v42 = vmax.f32 %v1750_v37, 0.0  ;;  %v1819_v52 = vld [vmem:[%s3790_s4 + $0x38] sm:$0xff] }
 0x63a   :  { %v1755_v53 = vpop.f32.mrf.mxu1 }
 0x63b   :  { %v1756_v33 = vadd.f32 %v1755_v53, %v1627_v27  ;;  %v1797_v41 = vmax.f32 %v1752_v35, 0.0  ;;  %v1370_v53 = vld [vmem:[%s3701_s22 + $0x40] sm:$0xff] }
 0x63c   :  { %v1757_v54 = vpop.f32.mrf.mxu1  ;;  %3006 = vmatmul.mubr.msk.f32.gmra.mxu0 %vm143_vm0, %v1370_v53 }
 0x63d   :  { %v1758_v30 = vadd.f32 %v1757_v54, %v1627_v27  ;;  %v1798_v40 = vmax.f32 %v1756_v33, 0.0  ;;  %1544 = vmatprep.mubr.f32.mxu0 %v3421_v44  ;;  %v1371_v54 = vld [vmem:[%s3701_s22 + $0x48] sm:$0xff] }
 0x63e   :  { %v1761_v55 = vpop.f32.mrf.mxu1 }
 0x63f   :  { %v1762_v28 = vadd.f32 %v1761_v55, %v1632_v18  ;;  %v1799_v39 = vmax.f32 %v1758_v30, 0.0  ;;  %v1372_v55 = vld [vmem:[%s3701_s22 + $0x50] sm:$0xff] }
 0x640   :  { %v1763_v56 = vpop.f32.mrf.mxu1  ;;  %3007 = vmatmul.mubr.msk.f32.gmra.mxu0 %vm143_vm0, %v1371_v54 }
 0x641   :  { %v1764_v25 = vadd.f32 %v1763_v56, %v1632_v18  ;;  %v1800_v38 = vmax.f32 %v1762_v28, 0.0  ;;  %1550 = vmatprep.mubr.f32.mxu0 %v3421_v44  ;;  %v1373_v56 = vld [vmem:[%s3701_s22 + $0x58] sm:$0xff] }
 0x642   :  { %v1767_v57 = vpop.f32.mrf.mxu1 }
 0x643   :  { %v1768_v23 = vadd.f32 %v1767_v57, %v1637_v13  ;;  %v1801_v36 = vmax.f32 %v1764_v25, 0.0  ;;  %v1374_v57 = vld [vmem:[%s3701_s22 + $0x60] sm:$0xff] }
 0x644   :  { %v1769_v58 = vpop.f32.mrf.mxu1  ;;  %3008 = vmatmul.mubr.msk.f32.gmra.mxu0 %vm143_vm0, %v1372_v55  ;;  %v2021_v55 = vld [vmem:[%s3843_s7] sm:$0xff] }
 0x645   :  { %v1770_v21 = vadd.f32 %v1769_v58, %v1637_v13  ;;  %v1802_v34 = vmax.f32 %v1768_v23, 0.0  ;;  %1556 = vmatprep.mubr.f32.mxu0 %v3421_v44  ;;  %v1375_v58 = vld [vmem:[%s3701_s22 + $0x68] sm:$0xff] }
 0x646   :  { %v1773_v59 = vpop.f32.mrf.mxu1 }
 0x647   :  { %v1774_v19 = vadd.f32 %v1773_v59, %v1642_v5  ;;  %v1803_v31 = vmax.f32 %v1770_v21, 0.0  ;;  %v1376_v59 = vld [vmem:[%s3701_s22 + $0x70] sm:$0xff] }
 0x648   :  { %v1775_v60 = vpop.f32.mrf.mxu1  ;;  %3009 = vmatmul.mubr.msk.f32.gmra.mxu0 %vm143_vm0, %v1373_v56  ;;  %v2022_v56 = vld [vmem:[%s3843_s7 + $0x8] sm:$0xff] }
 0x649   :  { %v1776_v16 = vadd.f32 %v1775_v60, %v1642_v5  ;;  %v1804_v29 = vmax.f32 %v1774_v19, 0.0  ;;  %1562 = vmatprep.mubr.f32.mxu0 %v3421_v44  ;;  %v1377_v60 = vld [vmem:[%s3701_s22 + $0x78] sm:$0xff] }
 0x64a   :  { %v1779_v61 = vpop.f32.mrf.mxu1 }
 0x64b   :  { %v1780_v14 = vadd.f32 %v1779_v61, %v1647_v3  ;;  %v1805_v26 = vmax.f32 %v1776_v16, 0.0 }
 0x64c   :  { %v1781_v63 = vpop.f32.mrf.mxu1  ;;  %3010 = vmatmul.mubr.msk.f32.gmra.mxu0 %vm143_vm0, %v1374_v57  ;;  %v2023_v57 = vld [vmem:[%s3843_s7 + $0x10] sm:$0xff] }
 0x64d   :  { %v1782_v11 = vadd.f32 %v1781_v63, %v1647_v3  ;;  %v1806_v24 = vmax.f32 %v1780_v14, 0.0  ;;  %1568 = vmatprep.mubr.f32.mxu0 %v3421_v44 }
 0x64e   :  { %v1785_v1 = vpop.f32.mrf.mxu1 }
 0x64f   :  { %v1786_v10 = vadd.f32 %v1785_v1, %v1652_v0  ;;  %v1807_v22 = vmax.f32 %v1782_v11, 0.0 }
 0x650   :  { %v1787_v2 = vpop.f32.mrf.mxu1  ;;  %3011 = vmatmul.mubr.msk.f32.gmra.mxu0 %vm143_vm0, %v1375_v58  ;;  %v2024_v58 = vld [vmem:[%s3843_s7 + $0x18] sm:$0xff] }
 0x651   :  { %v1788_v8 = vadd.f32 %v1787_v2, %v1652_v0  ;;  %v1808_v20 = vmax.f32 %v1786_v10, 0.0  ;;  %1574 = vmatprep.mubr.f32.mxu0 %v3421_v44  ;;  %v1861_v10 = vpop.permute.xlu1 %1860 }
 0x652   :  { %v1791_v4 = vpop.f32.mrf.mxu1 }
 0x653   :  { %v1792_v6 = vadd.f32 %v1791_v4, %v1657_v62  ;;  %v1809_v17 = vmax.f32 %v1788_v8, 0.0  ;;  %v1866_v8 = vpop.permute.xlu0 %1865 }
 0x654   :  { %v1793_v7 = vpop.f32.mrf.mxu1  ;;  %3012 = vmatmul.mubr.msk.f32.gmra.mxu0 %vm143_vm0, %v1376_v59  ;;  %v2025_v59 = vld [vmem:[%s3843_s7 + $0x20] sm:$0xff] }
 0x655   :  { %v1794_v9 = vadd.f32 %v1793_v7, %v1657_v62  ;;  %v1810_v15 = vmax.f32 %v1792_v6, 0.0  ;;  %1580 = vmatprep.mubr.f32.mxu0 %v3421_v44 }
 0x657   :  { %v1811_v12 = vmax.f32 %v1794_v9, 0.0  ;;  %v1856_v13 = vpop.permute.xlu0 %1855 }
 0x658   :  { %3013 = vmatmul.mubr.msk.f32.gmra.mxu0 %vm143_vm0, %v1377_v60  ;;  %v2026_v60 = vld [vmem:[%s3843_s7 + $0x28] sm:$0xff] }
 0x659   :  { %1908 = vmatprep.subr.mxu1 %v1811_v12  ;;  %2117 = vmatprep.mubr.f32.mxu0 %v3421_v44 }
 0x65a   :  { %1909 = vmatpush1.msra.mxu1 %v1810_v15  ;;  %v1851_v15 = vpop.permute.xlu1 %1850 }
 0x65b   :  { %1910 = vmatprep.subr.mxu1 %v1809_v17  ;;  %v1846_v23 = vpop.permute.xlu0 %1845 }
 0x65c   :  { %1911 = vmatpush1.msra.mxu1 %v1808_v20 }
 0x65d   :  { %1912 = vmatprep.subr.mxu1 %v1807_v22 }
 0x65e   :  { %1913 = vmatpush1.msra.mxu1 %v1806_v24  ;;  %v1841_v28 = vpop.permute.xlu1 %1840 }
 0x65f   :  { %1914 = vmatprep.subr.mxu1 %v1805_v26  ;;  %v1836_v37 = vpop.permute.xlu0 %1835 }
 0x660   :  { %1915 = vmatpush1.msra.mxu1 %v1804_v29 }
 0x661   :  { %1916 = vmatprep.subr.mxu1 %v1803_v31 }
 0x662   :  { %1917 = vmatpush1.msra.mxu1 %v1802_v34 }
 0x663   :  { %1918 = vmatprep.subr.mxu1 %v1801_v36 }
 0x664   :  { %1919 = vmatpush1.msra.mxu1 %v1800_v38 }
 0x665   :  { %1920 = vmatprep.subr.mxu1 %v1799_v39 }
 0x666   :  { %1921 = vmatpush1.msra.mxu1 %v1798_v40 }
 0x667   :  { %1922 = vmatprep.subr.mxu1 %v1797_v41 }
 0x668   :  { %1923 = vmatpush1.msra.mxu1 %v1796_v42  ;;  %v1831_v42 = vpop.permute.xlu1 %1830 }
 0x669   :  { %3022 = vmatmul.mubr.msk.f32.vlgmr.msra.gmra.mxu1 %vm401_vm1, %v1812_v43 }
 0x66a   :  { %1962 = vmatprep.mubr.f32.mxu1 %v3421_v44 }
 0x66d   :  { %3023 = vmatmul.mubr.msk.f32.gmra.mxu1 %vm401_vm1, %v1813_v45 }
 0x66e   :  { %1968 = vmatprep.mubr.f32.mxu1 %v3421_v44 }
 0x671   :  { %3024 = vmatmul.mubr.msk.f32.gmra.mxu1 %vm401_vm1, %v1814_v46 }
 0x672   :  { %1974 = vmatprep.mubr.f32.mxu1 %v3421_v44 }
 0x675   :  { %3025 = vmatmul.mubr.msk.f32.gmra.mxu1 %vm401_vm1, %v1815_v47 }
 0x676   :  { %1980 = vmatprep.mubr.f32.mxu1 %v3421_v44 }
 0x679   :  { %3026 = vmatmul.mubr.msk.f32.gmra.mxu1 %vm401_vm1, %v1816_v48 }
 0x67a   :  { %1986 = vmatprep.mubr.f32.mxu1 %v3421_v44 }
 0x67d   :  { %3027 = vmatmul.mubr.msk.f32.gmra.mxu1 %vm401_vm1, %v1817_v50 }
 0x67e   :  { %1992 = vmatprep.mubr.f32.mxu1 %v3421_v44 }
 0x681   :  { %3028 = vmatmul.mubr.msk.f32.gmra.mxu1 %vm401_vm1, %v1818_v51 }
 0x682   :  { %1998 = vmatprep.mubr.f32.mxu1 %v3421_v44 }
 0x685   :  { %3029 = vmatmul.mubr.msk.f32.gmra.mxu1 %vm401_vm1, %v1819_v52 }
 0x686   :  { %2342 = vmatprep.mubr.f32.mxu1 %v3421_v44 }
 0x729   :  { %v1958_v61 = vpop.f32.mrf.mxu1 }
 0x72a   :  { %v1959_v48 = vadd.f32 %v1958_v61, %v1831_v42  ;;  %v2027_v61 = vld [vmem:[%s3843_s7 + $0x30] sm:$0xff] }
 0x72b   :  { %v1960_v62 = vpop.f32.mrf.mxu1 }
 0x72c   :  { %v1961_v46 = vadd.f32 %v1960_v62, %v1831_v42  ;;  %v2005_v54 = vmax.f32 %v1959_v48, 0.0  ;;  %v2028_v62 = vld [vmem:[%s3843_s7 + $0x38] sm:$0xff] }
 0x72d   :  { %v1964_v63 = vpop.f32.mrf.mxu1 }
 0x72e   :  { %v1965_v43 = vadd.f32 %v1964_v63, %v1836_v37  ;;  %v2006_v53 = vmax.f32 %v1961_v46, 0.0  ;;  %v3869_v63 = vpop.f32.mrf.mxu0 }
 0x72f   :  { %v1966_v0 = vpop.f32.mrf.mxu1 }
 0x730   :  { %v1967_v40 = vadd.f32 %v1966_v0, %v1836_v37  ;;  %v2007_v52 = vmax.f32 %v1965_v43, 0.0  ;;  %v3871_v0 = vpop.f32.mrf.mxu0 }
 0x731   :  { %v1970_v1 = vpop.f32.mrf.mxu1 }
 0x732   :  { %v1971_v38 = vadd.f32 %v1970_v1, %v1841_v28  ;;  %v2008_v51 = vmax.f32 %v1967_v40, 0.0  ;;  %v1546_v1 = vpop.f32.mrf.mxu0 }
 0x733   :  { %v1972_v2 = vpop.f32.mrf.mxu1 }
 0x734   :  { %v1973_v35 = vadd.f32 %v1972_v2, %v1841_v28  ;;  %v2009_v50 = vmax.f32 %v1971_v38, 0.0  ;;  %v1548_v2 = vpop.f32.mrf.mxu0 }
 0x735   :  { %v1976_v3 = vpop.f32.mrf.mxu1 }
 0x736   :  { %v1977_v33 = vadd.f32 %v1976_v3, %v1846_v23  ;;  %v2010_v47 = vmax.f32 %v1973_v35, 0.0  ;;  %v1552_v3 = vpop.f32.mrf.mxu0 }
 0x737   :  { %v1978_v4 = vpop.f32.mrf.mxu1 }
 0x738   :  { %v1979_v31 = vadd.f32 %v1978_v4, %v1846_v23  ;;  %v2011_v45 = vmax.f32 %v1977_v33, 0.0  ;;  %v1554_v4 = vpop.f32.mrf.mxu0 }
 0x739   :  { %v1982_v5 = vpop.f32.mrf.mxu1 }
 0x73a   :  { %v1983_v29 = vadd.f32 %v1982_v5, %v1851_v15  ;;  %v2012_v41 = vmax.f32 %v1979_v31, 0.0  ;;  %v1558_v5 = vpop.f32.mrf.mxu0 }
 0x73b   :  { %v1984_v6 = vpop.f32.mrf.mxu1 }
 0x73c   :  { %v1985_v26 = vadd.f32 %v1984_v6, %v1851_v15  ;;  %v2013_v39 = vmax.f32 %v1983_v29, 0.0  ;;  %v1560_v6 = vpop.f32.mrf.mxu0 }
 0x73d   :  { %v1988_v7 = vpop.f32.mrf.mxu1 }
 0x73e   :  { %v1989_v24 = vadd.f32 %v1988_v7, %v1856_v13  ;;  %v2014_v36 = vmax.f32 %v1985_v26, 0.0  ;;  %v1564_v7 = vpop.f32.mrf.mxu0 }
 0x73f   :  { %v1990_v9 = vpop.f32.mrf.mxu1 }
 0x740   :  { %v1991_v21 = vadd.f32 %v1990_v9, %v1856_v13  ;;  %v2015_v34 = vmax.f32 %v1989_v24, 0.0 }
 0x741   :  { %v1994_v11 = vpop.f32.mrf.mxu1 }
 0x742   :  { %v1995_v20 = vadd.f32 %v1994_v11, %v1861_v10  ;;  %v2016_v32 = vmax.f32 %v1991_v21, 0.0 }
 0x743   :  { %v1996_v12 = vpop.f32.mrf.mxu1 }
 0x744   :  { %v1997_v18 = vadd.f32 %v1996_v12, %v1861_v10  ;;  %v2017_v30 = vmax.f32 %v1995_v20, 0.0 }
 0x745   :  { %v2000_v14 = vpop.f32.mrf.mxu1 }
 0x746   :  { %v2001_v16 = vadd.f32 %v2000_v14, %v1866_v8  ;;  %v2018_v27 = vmax.f32 %v1997_v18, 0.0 }
 0x747   :  { %v2002_v17 = vpop.f32.mrf.mxu1 }
 0x748   :  { %v2003_v19 = vadd.f32 %v2002_v17, %v1866_v8  ;;  %v2019_v25 = vmax.f32 %v2001_v16, 0.0  ;;  %v1566_v8 = vpop.f32.mrf.mxu0 }
 0x74a   :  { %v2020_v22 = vmax.f32 %v2003_v19, 0.0  ;;  %v1570_v9 = vpop.f32.mrf.mxu0 }
 0x74c   :  { %2069 = vmatprep.subr.mxu0 %v2020_v22  ;;  %v1572_v10 = vpop.f32.mrf.mxu0 }
 0x74d   :  { %2070 = vmatpush1.msra.mxu0 %v2019_v25 }
 0x74e   :  { %2071 = vmatprep.subr.mxu0 %v2018_v27  ;;  %v1576_v11 = vpop.f32.mrf.mxu0 }
 0x74f   :  { %2072 = vmatpush1.msra.mxu0 %v2017_v30 }
 0x750   :  { %2073 = vmatprep.subr.mxu0 %v2016_v32  ;;  %v1578_v12 = vpop.f32.mrf.mxu0 }
 0x751   :  { %2074 = vmatpush1.msra.mxu0 %v2015_v34 }
 0x752   :  { %2075 = vmatprep.subr.mxu0 %v2014_v36  ;;  %v1582_v13 = vpop.f32.mrf.mxu0 }
 0x753   :  { %2076 = vmatpush1.msra.mxu0 %v2013_v39 }
 0x754   :  { %2077 = vmatprep.subr.mxu0 %v2012_v41  ;;  %v1584_v14 = vpop.f32.mrf.mxu0 }
 0x755   :  { %2078 = vmatpush1.msra.mxu0 %v2011_v45 }
 0x756   :  { %2079 = vmatprep.subr.mxu0 %v2010_v47 }
 0x757   :  { %2080 = vmatpush1.msra.mxu0 %v2009_v50 }
 0x758   :  { %2081 = vmatprep.subr.mxu0 %v2008_v51 }
 0x759   :  { %2082 = vmatpush1.msra.mxu0 %v2007_v52 }
 0x75a   :  { %2083 = vmatprep.subr.mxu0 %v2006_v53 }
 0x75b   :  { %2084 = vmatpush1.msra.mxu0 %v2005_v54 }
 0x75c   :  { %3030 = vmatmul.mubr.msk.f32.vlgmr.msra.gmra.mxu0 %vm401_vm1, %v2021_v55 }
 0x75d   :  { %2123 = vmatprep.mubr.f32.mxu0 %v3421_v44 }
 0x760   :  { %3031 = vmatmul.mubr.msk.f32.gmra.mxu0 %vm401_vm1, %v2022_v56 }
 0x761   :  { %2129 = vmatprep.mubr.f32.mxu0 %v3421_v44 }
 0x764   :  { %3032 = vmatmul.mubr.msk.f32.gmra.mxu0 %vm401_vm1, %v2023_v57 }
 0x765   :  { %2135 = vmatprep.mubr.f32.mxu0 %v3421_v44 }
 0x768   :  { %3033 = vmatmul.mubr.msk.f32.gmra.mxu0 %vm401_vm1, %v2024_v58 }
 0x769   :  { %2141 = vmatprep.mubr.f32.mxu0 %v3421_v44 }
 0x76c   :  { %3034 = vmatmul.mubr.msk.f32.gmra.mxu0 %vm401_vm1, %v2025_v59 }
 0x76d   :  { %2147 = vmatprep.mubr.f32.mxu0 %v3421_v44 }
 0x770   :  { %3035 = vmatmul.mubr.msk.f32.gmra.mxu0 %vm401_vm1, %v2026_v60 }
 0x771   :  { %2153 = vmatprep.mubr.f32.mxu0 %v3421_v44 }
 0x774   :  { %3036 = vmatmul.mubr.msk.f32.gmra.mxu0 %vm401_vm1, %v2027_v61 }
 0x775   :  { %2159 = vmatprep.mubr.f32.mxu0 %v3421_v44 }
 0x778   :  { %3037 = vmatmul.mubr.msk.f32.gmra.mxu0 %vm401_vm1, %v2028_v62 }
 0x779   :  { %2551 = vmatprep.mubr.f32.mxu0 %v3421_v44 }
 0x81c   :  { %v2119_v15 = vpop.f32.mrf.mxu0 }
 0x81d   :  { %v2166_v59 = vadd.f32 %v2119_v15, %v3869_v63  ;;  %v2199_v63 = vld [vmem:[%s3876_s12 + $0x8] sm:$0xff] }
 0x81e   :  { %v2121_v16 = vpop.f32.mrf.mxu0 }
 0x81f   :  { %v2167_v57 = vadd.f32 %v2121_v16, %v3871_v0  ;;  %v2200_v0 = vld [vmem:[%s3876_s12 + $0x10] sm:$0xff] }
 0x820   :  { %v2125_v17 = vpop.f32.mrf.mxu0 }
 0x821   :  { %v2168_v55 = vadd.f32 %v2125_v17, %v1546_v1  ;;  %v2182_v1 = vmax.f32 %v2166_v59, 0.0 }
 0x822   :  { %v2127_v18 = vpop.f32.mrf.mxu0 }
 0x823   :  { %v2169_v53 = vadd.f32 %v2127_v18, %v1548_v2  ;;  %v2184_v62 = vmax.f32 %v2168_v55, 0.0  ;;  %v2183_v2 = vmax.f32 %v2167_v57, 0.0 }
 0x824   :  { %v2131_v19 = vpop.f32.mrf.mxu0 }
 0x825   :  { %v2170_v51 = vadd.f32 %v2131_v19, %v1552_v3  ;;  %v2185_v61 = vmax.f32 %v2169_v53, 0.0  ;;  %v2198_v3 = vld [vmem:[%s3876_s12] sm:$0xff] }
 0x826   :  { %v2133_v20 = vpop.f32.mrf.mxu0 }
 0x827   :  { %v2171_v48 = vadd.f32 %v2133_v20, %v1554_v4  ;;  %v2186_v60 = vmax.f32 %v2170_v51, 0.0  ;;  %v2201_v4 = vld [vmem:[%s3876_s12 + $0x18] sm:$0xff]  ;;  %v2252_v20 = vpop.permute.xlu0 %2251 }
 0x828   :  { %v2137_v21 = vpop.f32.mrf.mxu0 }
 0x829   :  { %v2172_v46 = vadd.f32 %v2137_v21, %v1558_v5  ;;  %v2187_v58 = vmax.f32 %v2171_v48, 0.0  ;;  %v2202_v5 = vld [vmem:[%s3876_s12 + $0x20] sm:$0xff] }
 0x82a   :  { %v2139_v22 = vpop.f32.mrf.mxu0 }
 0x82b   :  { %v2173_v43 = vadd.f32 %v2139_v22, %v1560_v6  ;;  %v2188_v56 = vmax.f32 %v2172_v46, 0.0  ;;  %v2203_v6 = vld [vmem:[%s3876_s12 + $0x28] sm:$0xff]  ;;  %v2247_v22 = vpop.permute.xlu1 %2246 }
 0x82c   :  { %v2143_v23 = vpop.f32.mrf.mxu0 }
 0x82d   :  { %v2174_v41 = vadd.f32 %v2143_v23, %v1564_v7  ;;  %v2189_v54 = vmax.f32 %v2173_v43, 0.0  ;;  %v2204_v7 = vld [vmem:[%s3876_s12 + $0x30] sm:$0xff] }
 0x82e   :  { %v2145_v24 = vpop.f32.mrf.mxu0 }
 0x82f   :  { %v2175_v39 = vadd.f32 %v2145_v24, %v1566_v8  ;;  %v2190_v52 = vmax.f32 %v2174_v41, 0.0  ;;  %v2205_v8 = vld [vmem:[%s3876_s12 + $0x38] sm:$0xff] }
 0x830   :  { %v2149_v25 = vpop.f32.mrf.mxu0 }
 0x831   :  { %v2176_v37 = vadd.f32 %v2149_v25, %v1570_v9  ;;  %v2191_v50 = vmax.f32 %v2175_v39, 0.0  ;;  %v2242_v25 = vpop.permute.xlu0 %2241 }
 0x832   :  { %v2151_v26 = vpop.f32.mrf.mxu0 }
 0x833   :  { %v2177_v35 = vadd.f32 %v2151_v26, %v1572_v10  ;;  %v2192_v47 = vmax.f32 %v2176_v37, 0.0 }
 0x834   :  { %v2155_v27 = vpop.f32.mrf.mxu0 }
 0x835   :  { %v2178_v34 = vadd.f32 %v2155_v27, %v1576_v11  ;;  %v2193_v45 = vmax.f32 %v2177_v35, 0.0  ;;  %v2237_v27 = vpop.permute.xlu1 %2236  ;;  %v2232_v35 = vpop.permute.xlu0 %2231 }
 0x836   :  { %v2157_v28 = vpop.f32.mrf.mxu0 }
 0x837   :  { %v2179_v32 = vadd.f32 %v2157_v28, %v1578_v12  ;;  %v2194_v42 = vmax.f32 %v2178_v34, 0.0 }
 0x838   :  { %v2161_v29 = vpop.f32.mrf.mxu0 }
 0x839   :  { %v2180_v30 = vadd.f32 %v2161_v29, %v1582_v13  ;;  %v2195_v40 = vmax.f32 %v2179_v32, 0.0  ;;  %v2222_v51 = vpop.permute.xlu0 %2221 }
 0x83a   :  { %v2163_v31 = vpop.f32.mrf.mxu0 }
 0x83b   :  { %v2181_v33 = vadd.f32 %v2163_v31, %v1584_v14  ;;  %v2196_v38 = vmax.f32 %v2180_v30, 0.0 }
 0x83d   :  { %v2197_v36 = vmax.f32 %v2181_v33, 0.0 }
 0x83f   :  { %2294 = vmatprep.subr.mxu1 %v2197_v36 }
 0x840   :  { %2295 = vmatpush1.msra.mxu1 %v2196_v38 }
 0x841   :  { %2296 = vmatprep.subr.mxu1 %v2195_v40  ;;  %v2227_v40 = vpop.permute.xlu1 %2226 }
 0x842   :  { %2297 = vmatpush1.msra.mxu1 %v2194_v42 }
 0x843   :  { %2298 = vmatprep.subr.mxu1 %v2193_v45 }
 0x844   :  { %2299 = vmatpush1.msra.mxu1 %v2192_v47 }
 0x845   :  { %2300 = vmatprep.subr.mxu1 %v2191_v50 }
 0x846   :  { %2301 = vmatpush1.msra.mxu1 %v2190_v52 }
 0x847   :  { %2302 = vmatprep.subr.mxu1 %v2189_v54 }
 0x848   :  { %2303 = vmatpush1.msra.mxu1 %v2188_v56  ;;  %v2217_v56 = vpop.permute.xlu1 %2216 }
 0x849   :  { %2304 = vmatprep.subr.mxu1 %v2187_v58 }
 0x84a   :  { %2305 = vmatpush1.msra.mxu1 %v2186_v60 }
 0x84b   :  { %2306 = vmatprep.subr.mxu1 %v2185_v61 }
 0x84c   :  { %2307 = vmatpush1.msra.mxu1 %v2184_v62 }
 0x84d   :  { %2308 = vmatprep.subr.mxu1 %v2183_v2 }
 0x84e   :  { %2309 = vmatpush1.msra.mxu1 %v2182_v1 }
 0x84f   :  { %3038 = vmatmul.mubr.msk.f32.vlgmr.msra.gmra.mxu1 %vm401_vm1, %v2198_v3 }
 0x850   :  { %2348 = vmatprep.mubr.f32.mxu1 %v3421_v44 }
 0x853   :  { %3039 = vmatmul.mubr.msk.f32.gmra.mxu1 %vm401_vm1, %v2199_v63 }
 0x854   :  { %2354 = vmatprep.mubr.f32.mxu1 %v3421_v44 }
 0x857   :  { %3040 = vmatmul.mubr.msk.f32.gmra.mxu1 %vm401_vm1, %v2200_v0  ;;  %v2407_v0 = vld [vmem:[%s3907_s16] sm:$0xff] }
 0x858   :  { %2360 = vmatprep.mubr.f32.mxu1 %v3421_v44 }
 0x85b   :  { %3041 = vmatmul.mubr.msk.f32.gmra.mxu1 %vm401_vm1, %v2201_v4  ;;  %v2408_v4 = vld [vmem:[%s3907_s16 + $0x8] sm:$0xff] }
 0x85c   :  { %2366 = vmatprep.mubr.f32.mxu1 %v3421_v44 }
 0x85f   :  { %3042 = vmatmul.mubr.msk.f32.gmra.mxu1 %vm401_vm1, %v2202_v5  ;;  %v2409_v5 = vld [vmem:[%s3907_s16 + $0x10] sm:$0xff] }
 0x860   :  { %2372 = vmatprep.mubr.f32.mxu1 %v3421_v44 }
 0x863   :  { %3043 = vmatmul.mubr.msk.f32.gmra.mxu1 %vm401_vm1, %v2203_v6  ;;  %v2410_v6 = vld [vmem:[%s3907_s16 + $0x18] sm:$0xff] }
 0x864   :  { %2378 = vmatprep.mubr.f32.mxu1 %v3421_v44 }
 0x867   :  { %3044 = vmatmul.mubr.msk.f32.gmra.mxu1 %vm401_vm1, %v2204_v7  ;;  %v2411_v7 = vld [vmem:[%s3907_s16 + $0x20] sm:$0xff] }
 0x868   :  { %2384 = vmatprep.mubr.f32.mxu1 %v3421_v44 }
 0x86b   :  { %3045 = vmatmul.mubr.msk.f32.gmra.mxu1 %vm401_vm1, %v2205_v8  ;;  %v2412_v8 = vld [vmem:[%s3907_s16 + $0x28] sm:$0xff] }
 0x86c   :  { %2710 = vmatprep.mubr.f32.mxu1 %v3421_v44 }
 0x90f   :  { %v2344_v9 = vpop.f32.mrf.mxu1 }
 0x910   :  { %v2345_v61 = vadd.f32 %v2344_v9, %v2217_v56  ;;  %v2413_v9 = vld [vmem:[%s3907_s16 + $0x30] sm:$0xff] }
 0x911   :  { %v2346_v10 = vpop.f32.mrf.mxu1 }
 0x912   :  { %v2347_v59 = vadd.f32 %v2346_v10, %v2217_v56  ;;  %v2391_v63 = vmax.f32 %v2345_v61, 0.0  ;;  %v2414_v10 = vld [vmem:[%s3907_s16 + $0x38] sm:$0xff] }
 0x913   :  { %v2350_v11 = vpop.f32.mrf.mxu1 }
 0x914   :  { %v2351_v57 = vadd.f32 %v2350_v11, %v2222_v51  ;;  %v2392_v3 = vmax.f32 %v2347_v59, 0.0 }
 0x915   :  { %v2352_v12 = vpop.f32.mrf.mxu1 }
 0x916   :  { %v2353_v54 = vadd.f32 %v2352_v12, %v2222_v51  ;;  %v2393_v1 = vmax.f32 %v2351_v57, 0.0 }
 0x917   :  { %v2356_v13 = vpop.f32.mrf.mxu1 }
 0x918   :  { %v2357_v52 = vadd.f32 %v2356_v13, %v2227_v40  ;;  %v2394_v2 = vmax.f32 %v2353_v54, 0.0 }
 0x919   :  { %v2358_v14 = vpop.f32.mrf.mxu1 }
 0x91a   :  { %v2359_v48 = vadd.f32 %v2358_v14, %v2227_v40  ;;  %v2395_v62 = vmax.f32 %v2357_v52, 0.0 }
 0x91b   :  { %v2362_v15 = vpop.f32.mrf.mxu1 }
 0x91c   :  { %v2363_v46 = vadd.f32 %v2362_v15, %v2232_v35  ;;  %v2396_v60 = vmax.f32 %v2359_v48, 0.0 }
 0x91d   :  { %v2364_v16 = vpop.f32.mrf.mxu1 }
 0x91e   :  { %v2365_v43 = vadd.f32 %v2364_v16, %v2232_v35  ;;  %v2397_v58 = vmax.f32 %v2363_v46, 0.0 }
 0x91f   :  { %v2368_v17 = vpop.f32.mrf.mxu1 }
 0x920   :  { %v2369_v41 = vadd.f32 %v2368_v17, %v2237_v27  ;;  %v2398_v55 = vmax.f32 %v2365_v43, 0.0 }
 0x921   :  { %v2370_v18 = vpop.f32.mrf.mxu1 }
 0x922   :  { %v2371_v38 = vadd.f32 %v2370_v18, %v2237_v27  ;;  %v2399_v53 = vmax.f32 %v2369_v41, 0.0 }
 0x923   :  { %v2374_v19 = vpop.f32.mrf.mxu1 }
 0x924   :  { %v2375_v36 = vadd.f32 %v2374_v19, %v2242_v25  ;;  %v2400_v50 = vmax.f32 %v2371_v38, 0.0 }
 0x925   :  { %v2376_v21 = vpop.f32.mrf.mxu1 }
 0x926   :  { %v2377_v33 = vadd.f32 %v2376_v21, %v2242_v25  ;;  %v2401_v47 = vmax.f32 %v2375_v36, 0.0 }
 0x927   :  { %v2380_v23 = vpop.f32.mrf.mxu1 }
 0x928   :  { %v2381_v32 = vadd.f32 %v2380_v23, %v2247_v22  ;;  %v2402_v45 = vmax.f32 %v2377_v33, 0.0 }
 0x929   :  { %v2382_v24 = vpop.f32.mrf.mxu1 }
 0x92a   :  { %v2383_v30 = vadd.f32 %v2382_v24, %v2247_v22  ;;  %v2403_v42 = vmax.f32 %v2381_v32, 0.0  ;;  %v2461_v22 = vpop.permute.xlu0 %2460  ;;  %v2456_v24 = vpop.permute.xlu1 %2455 }
 0x92b   :  { %v2386_v26 = vpop.f32.mrf.mxu1 }
 0x92c   :  { %v2387_v28 = vadd.f32 %v2386_v26, %v2252_v20  ;;  %v2404_v39 = vmax.f32 %v2383_v30, 0.0 }
 0x92d   :  { %v2388_v29 = vpop.f32.mrf.mxu1 }
 0x92e   :  { %v2389_v31 = vadd.f32 %v2388_v29, %v2252_v20  ;;  %v2405_v37 = vmax.f32 %v2387_v28, 0.0  ;;  %v2451_v27 = vpop.permute.xlu0 %2450  ;;  %v2446_v29 = vpop.permute.xlu1 %2445 }
 0x930   :  { %v2406_v34 = vmax.f32 %v2389_v31, 0.0 }
 0x932   :  { %2503 = vmatprep.subr.mxu0 %v2406_v34 }
 0x933   :  { %2504 = vmatpush1.msra.mxu0 %v2405_v37  ;;  %v2441_v37 = vpop.permute.xlu0 %2440 }
 0x934   :  { %2505 = vmatprep.subr.mxu0 %v2404_v39 }
 0x935   :  { %2506 = vmatpush1.msra.mxu0 %v2403_v42  ;;  %v2436_v42 = vpop.permute.xlu1 %2435 }
 0x936   :  { %2507 = vmatprep.subr.mxu0 %v2402_v45 }
 0x937   :  { %2508 = vmatpush1.msra.mxu0 %v2401_v47 }
 0x938   :  { %2509 = vmatprep.subr.mxu0 %v2400_v50 }
 0x939   :  { %2510 = vmatpush1.msra.mxu0 %v2399_v53  ;;  %v2431_v53 = vpop.permute.xlu0 %2430 }
 0x93a   :  { %2511 = vmatprep.subr.mxu0 %v2398_v55 }
 0x93b   :  { %2512 = vmatpush1.msra.mxu0 %v2397_v58  ;;  %v2426_v58 = vpop.permute.xlu1 %2425 }
 0x93c   :  { %2513 = vmatprep.subr.mxu0 %v2396_v60 }
 0x93d   :  { %2514 = vmatpush1.msra.mxu0 %v2395_v62 }
 0x93e   :  { %2515 = vmatprep.subr.mxu0 %v2394_v2 }
 0x93f   :  { %2516 = vmatpush1.msra.mxu0 %v2393_v1 }
 0x940   :  { %2517 = vmatprep.subr.mxu0 %v2392_v3 }
 0x941   :  { %2518 = vmatpush1.msra.mxu0 %v2391_v63 }
 0x942   :  { %3046 = vmatmul.mubr.msk.f32.vlgmr.msra.gmra.mxu0 %vm401_vm1, %v2407_v0 }
 0x943   :  { %2557 = vmatprep.mubr.f32.mxu0 %v3421_v44 }
 0x946   :  { %3047 = vmatmul.mubr.msk.f32.gmra.mxu0 %vm401_vm1, %v2408_v4 }
 0x947   :  { %2563 = vmatprep.mubr.f32.mxu0 %v3421_v44 }
 0x94a   :  { %3048 = vmatmul.mubr.msk.f32.gmra.mxu0 %vm401_vm1, %v2409_v5  ;;  %v2616_v5 = vld [vmem:[%s2932_s20] sm:$0xff] }
 0x94b   :  { %2569 = vmatprep.mubr.f32.mxu0 %v3421_v44 }
 0x94e   :  { %3049 = vmatmul.mubr.msk.f32.gmra.mxu0 %vm401_vm1, %v2410_v6  ;;  %v2617_v6 = vld [vmem:[%s2932_s20 + $0x8] sm:$0xff] }
 0x94f   :  { %2575 = vmatprep.mubr.f32.mxu0 %v3421_v44 }
 0x952   :  { %3050 = vmatmul.mubr.msk.f32.gmra.mxu0 %vm401_vm1, %v2411_v7  ;;  %v2618_v7 = vld [vmem:[%s2932_s20 + $0x10] sm:$0x1] }
 0x953   :  { %2581 = vmatprep.mubr.f32.mxu0 %v3421_v44 }
 0x956   :  { %3051 = vmatmul.mubr.msk.f32.gmra.mxu0 %vm401_vm1, %v2412_v8 }
 0x957   :  { %2587 = vmatprep.mubr.f32.mxu0 %v3421_v44 }
 0x95a   :  { %3052 = vmatmul.mubr.msk.f32.gmra.mxu0 %vm401_vm1, %v2413_v9 }
 0x95b   :  { %2593 = vmatprep.mubr.f32.mxu0 %v3421_v44 }
 0x95e   :  { %3053 = vmatmul.mubr.msk.f32.gmra.mxu0 %vm401_vm1, %v2414_v10 }
 0xa02   :  { %v2553_v11 = vpop.f32.mrf.mxu0 }
 0xa03   :  { %v2554_v2 = vadd.f32 %v2553_v11, %v2426_v58  ;;  %v2630_v11 = vpop.permute.xlu0 %2629 }
 0xa04   :  { %v2555_v12 = vpop.f32.mrf.mxu0 }
 0xa05   :  { %v2556_v61 = vadd.f32 %v2555_v12, %v2426_v58  ;;  %v2600_v4 = vmax.f32 %v2554_v2, 0.0  ;;  %v2625_v12 = vpop.permute.xlu1 %2624 }
 0xa06   :  { %v2559_v13 = vpop.f32.mrf.mxu0 }
 0xa07   :  { %v2560_v59 = vadd.f32 %v2559_v13, %v2431_v53  ;;  %v2601_v0 = vmax.f32 %v2556_v61, 0.0 }
 0xa08   :  { %v2561_v14 = vpop.f32.mrf.mxu0 }
 0xa09   :  { %v2562_v56 = vadd.f32 %v2561_v14, %v2431_v53  ;;  %v2602_v63 = vmax.f32 %v2560_v59, 0.0 }
 0xa0a   :  { %v2565_v15 = vpop.f32.mrf.mxu0 }
 0xa0b   :  { %v2566_v54 = vadd.f32 %v2565_v15, %v2436_v42  ;;  %v2603_v3 = vmax.f32 %v2562_v56, 0.0 }
 0xa0c   :  { %v2567_v16 = vpop.f32.mrf.mxu0 }
 0xa0d   :  { %v2568_v51 = vadd.f32 %v2567_v16, %v2436_v42  ;;  %v2604_v1 = vmax.f32 %v2566_v54, 0.0 }
 0xa0e   :  { %v2571_v17 = vpop.f32.mrf.mxu0 }
 0xa0f   :  { %v2572_v48 = vadd.f32 %v2571_v17, %v2441_v37  ;;  %v2605_v62 = vmax.f32 %v2568_v51, 0.0 }
 0xa10   :  { %v2573_v18 = vpop.f32.mrf.mxu0 }
 0xa11   :  { %v2574_v46 = vadd.f32 %v2573_v18, %v2441_v37  ;;  %v2606_v60 = vmax.f32 %v2572_v48, 0.0 }
 0xa12   :  { %v2577_v19 = vpop.f32.mrf.mxu0 }
 0xa13   :  { %v2578_v43 = vadd.f32 %v2577_v19, %v2446_v29  ;;  %v2607_v57 = vmax.f32 %v2574_v46, 0.0 }
 0xa14   :  { %v2579_v20 = vpop.f32.mrf.mxu0 }
 0xa15   :  { %v2580_v40 = vadd.f32 %v2579_v20, %v2446_v29  ;;  %v2608_v55 = vmax.f32 %v2578_v43, 0.0  ;;  %v2817_v29 = vld [vmem:[%s2913_s28] sm:$0x1] }
 0xa16   :  { %v2583_v21 = vpop.f32.mrf.mxu0 }
 0xa17   :  { %v2584_v38 = vadd.f32 %v2583_v21, %v2451_v27  ;;  %v2609_v52 = vmax.f32 %v2580_v40, 0.0  ;;  %v2735_v21 = vld [vmem:[%s2933_s24] sm:$0x7] }
 0xa18   :  { %v2585_v23 = vpop.f32.mrf.mxu0 }
 0xa19   :  { %v2586_v35 = vadd.f32 %v2585_v23, %v2451_v27  ;;  %v2610_v50 = vmax.f32 %v2584_v38, 0.0  ;;  %v2635_v23 = vpop.permute.xlu0 %2634 }
 0xa1a   :  { %v2589_v25 = vpop.f32.mrf.mxu0 }
 0xa1b   :  { %v2590_v34 = vadd.f32 %v2589_v25, %v2456_v24  ;;  %v2611_v47 = vmax.f32 %v2586_v35, 0.0 }
 0xa1c   :  { %v2591_v26 = vpop.f32.mrf.mxu0 }
 0xa1d   :  { %v2592_v32 = vadd.f32 %v2591_v26, %v2456_v24  ;;  %v2612_v45 = vmax.f32 %v2590_v34, 0.0  ;;  %v2740_v53 = vpop.permute.xlu0 %2739 }
 0xa1e   :  { %v2595_v28 = vpop.f32.mrf.mxu0 }
 0xa1f   :  { %v2596_v30 = vadd.f32 %v2595_v28, %v2461_v22  ;;  %v2613_v41 = vmax.f32 %v2592_v32, 0.0  ;;  %v1276_v28 = vpop.permute.xlu1 %1275 }
 0xa20   :  { %v2597_v31 = vpop.f32.mrf.mxu0 }
 0xa21   :  { %v2598_v33 = vadd.f32 %v2597_v31, %v2461_v22  ;;  %v2614_v39 = vmax.f32 %v2596_v30, 0.0  ;;  %v1348_v30 = vadd.f32 %v3785_v49, %v1276_v28  ;;  %v2819_v49 = vlaneseq }
 0xa23   :  { %v2615_v36 = vmax.f32 %v2598_v33, 0.0  ;;  %v1351_v33 = vmax.f32 %v1348_v30, 0.0  ;;  %v2820_v48 = vshrl.u32 %v2819_v49, 7  ;;  %3395 = vtanh.f32 %v1348_v30 }
 0xa25   :  { %2662 = vmatprep.subr.mxu1 %v2615_v36  ;;  %v2829_v36 = vrot.slane %v1351_v33, 3  ;;  %v2821_v51 = vsub.s32 0, %v2820_v48 }
 0xa26   :  { %2663 = vmatpush1.msra.mxu1 %v2614_v39 }
 0xa27   :  { %2664 = vmatprep.subr.mxu1 %v2613_v41 }
 0xa28   :  { %2665 = vmatpush1.msra.mxu1 %v2612_v45 }
 0xa29   :  { %2666 = vmatprep.subr.mxu1 %v2611_v47 }
 0xa2a   :  { %2667 = vmatpush1.msra.mxu1 %v2610_v50 }
 0xa2b   :  { %2668 = vmatprep.subr.mxu1 %v2609_v52  ;;  %v2822_v52 = vrot.slane %v2817_v29, %v2821_v51 }
 0xa2c   :  { %2669 = vmatpush1.msra.mxu1 %v2608_v55 }
 0xa2d   :  { %2670 = vmatprep.subr.mxu1 %v2607_v57 }
 0xa2e   :  { %2671 = vmatpush1.msra.mxu1 %v2606_v60 }
 0xa2f   :  { %2672 = vmatprep.subr.mxu1 %v2605_v62 }
 0xa30   :  { %2673 = vmatpush1.msra.mxu1 %v2604_v1  ;;  %v3396_v60 = vpop.eup %3395 }
 0xa31   :  { %2674 = vmatprep.subr.mxu1 %v2603_v3  ;;  %v2853_v62 = vadd.f32 1.0, %v3396_v60 }
 0xa32   :  { %2675 = vmatpush1.msra.mxu1 %v2602_v63  ;;  %v2869_v63 = vsub.s32 1, %v2820_v48 }
 0xa33   :  { %2676 = vmatprep.subr.mxu1 %v2601_v0  ;;  %v2854_v3 = vmul.f32 0.5, %v2853_v62  ;;  %v2880_v0 = vsub.s32 2, %v2820_v48 }
 0xa34   :  { %2677 = vmatpush1.msra.mxu1 %v2600_v4 }
 0xa35   :  { %3054 = vmatmul.mubr.msk.f32.vlgmr.msra.gmra.mxu1 %vm401_vm1, %v2616_v5 }
 0xa36   :  { %2716 = vmatprep.mubr.f32.mxu1 %v3421_v44 }
 0xa39   :  { %3055 = vmatmul.mubr.msk.f32.gmra.mxu1 %vm401_vm1, %v2617_v6 }
 0xa3a   :  { %2722 = vmatprep.mubr.f32.mxu1 %v3421_v44 }
 0xa3d   :  { %3056 = vmatmul.mubr.msk.f32.gmra.mxu1 %vm401_vm1, %v2618_v7 }
 0xa3e   :  { %2810 = vmatprep.mubr.f32.mxu1 %v3421_v44 }
 0xaf5   :  { %v2712_v8 = vpop.f32.mrf.mxu1 }
 0xaf6   :  { %v2713_v17 = vadd.f32 %v2712_v8, %v2625_v12 }
 0xaf7   :  { %v2714_v9 = vpop.f32.mrf.mxu1 }
 0xaf8   :  { %v2715_v15 = vadd.f32 %v2714_v9, %v2625_v12  ;;  %v2729_v44 = vmax.f32 %v2713_v17, 0.0 }
 0xaf9   :  { %v2718_v10 = vpop.f32.mrf.mxu1 }
 0xafa   :  { %v2719_v13 = vadd.f32 %v2718_v10, %v2630_v11  ;;  %v2730_v20 = vmax.f32 %v2715_v15, 0.0  ;;  %v2855_v10 = vsel %vm2841_vm6, %v2854_v3, %v1351_v33 }
 0xafb   :  { %v2720_v14 = vpop.f32.mrf.mxu1 }
 0xafc   :  { %v2721_v16 = vadd.f32 %v2720_v14, %v2630_v11  ;;  %v2731_v19 = vmax.f32 %v2719_v13, 0.0 }
 0xafd   :  { %v2724_v22 = vpop.f32.mrf.mxu1 }
 0xafe   :  { %v2732_v18 = vmax.f32 %v2721_v16, 0.0  ;;  %v2725_v24 = vadd.f32 %v2724_v22, %v2635_v23 }
 0xaff   :  { %v2726_v25 = vpop.f32.mrf.mxu1 }
 0xb00   :  { %2774 = vmatprep.subr.mxu1 %v2732_v18  ;;  %v2727_v26 = vadd.f32 %v2726_v25, %v2635_v23  ;;  %v2733_v27 = vmax.f32 %v2725_v24, 0.0 }
 0xb01   :  { %2775 = vmatpush1.msra.mxu1 %v2731_v19 }
 0xb02   :  { %2776 = vmatprep.subr.mxu1 %v2730_v20  ;;  %v2734_v31 = vmax.f32 %v2727_v26, 0.0  ;;  %v2825_v32 = vmul.f32 %v2817_v29, %v2733_v27 }
 0xb03   :  { %2777 = vmatpush1.msra.mxu1 %v2729_v44 }
 0xb04   :  { %3057 = vmatmul.mubr.msk.f32.vlgmr.msra.gmra.mxu1 %vm2742_vm3, %v2735_v21  ;;  %v2827_v34 = vmul.f32 %v2817_v29, %v2734_v31  ;;  %v2832_v35 = vrot.slane %v2825_v32, 7  ;;  %v2864_v7 = vrot.slane %v2825_v32, 5 }
 0xb06   :  { %v2835_v37 = vrot.slane %v2827_v34, 6  ;;  %v2838_v38 = vsel %vm2837_vm4, %v2829_v36, %v2832_v35  ;;  %v2875_v11 = vrot.slane %v2827_v34, 5 }
 0xb08   :  { %v2840_v39 = vsel %vm2839_vm5, %v2838_v38, %v2835_v37 }
 0xb09   :  { %v2842_v40 = vsel %vm2841_vm6, %v2840_v39, 0.0 }
 0xb0a   :  { %v2843_v41 = vrot.slane %v2842_v40, 4 }
 0xb0c   :  { %v2844_v42 = vadd.f32 %v2843_v41, %v2842_v40 }
 0xb0e   :  { %v2845_v43 = vrot.slane %v2844_v42, 2 }
 0xb10   :  { %v2846_v45 = vadd.f32 %v2845_v43, %v2844_v42 }
 0xb12   :  { %v2847_v46 = vrot.slane %v2846_v45, 1 }
 0xb14   :  { %v2848_v47 = vadd.f32 %v2847_v46, %v2846_v45 }
 0xb16   :  { %v2849_v50 = vadd.f32 1e-05, %v2848_v47 }
 0xb18   :  { %3397 = vrcp.f32 %v2849_v50 }
 0xb25   :  { %v3398_v61 = vpop.eup %3397 }
 0xb26   :  { %v2851_v2 = vmul.f32 %v3398_v61, %v2840_v39 }
 0xb28   :  { %v2859_v6 = vrot.slane %v2851_v2, %v2821_v51  ;;  %v2870_v12 = vrot.slane %v2851_v2, %v2869_v63  ;;  %v2881_v13 = vrot.slane %v2851_v2, %v2880_v0  ;;  %v2895_v16 = vrot.slane %v2851_v2, 4 }
 0xb2a   :  { %v2860_v17 = vmul.f32 %v2859_v6, %v2855_v10 }
 0xb2c   :  { %v2886_v25 = vrot.slane %v2860_v17, 4 }
 0xbc4   :  { %v2812_v54 = vpop.f32.mrf.mxu1 }
 0xbc5   :  { %v2813_v55 = vadd.f32 %v2812_v54, %v2740_v53 }
 0xbc6   :  { %v2814_v56 = vpop.f32.mrf.mxu1 }
 0xbc7   :  { %v2824_v57 = vmul.f32 %v2822_v52, %v2813_v55  ;;  %v2815_v58 = vadd.f32 %v2814_v56, %v2740_v53 }
 0xbc9   :  { %3399 = vtanh.f32 %v2824_v57  ;;  %v2826_v59 = vmul.f32 %v2822_v52, %v2815_v58 }
 0xbcb   :  { %3401 = vtanh.f32 %v2826_v59 }
 0xbd6   :  { %v3400_v1 = vpop.eup %3399 }
 0xbd7   :  { %v2862_v4 = vadd.f32 1.0, %v3400_v1 }
 0xbd8   :  { %v3402_v5 = vpop.eup %3401 }
 0xbd9   :  { %v2863_v8 = vmul.f32 0.5, %v2862_v4  ;;  %v2873_v9 = vadd.f32 1.0, %v3402_v5 }
 0xbdb   :  { %v2866_v14 = vsel %vm2841_vm6, %v2863_v8, %v2864_v7  ;;  %v2874_v15 = vmul.f32 0.5, %v2873_v9 }
 0xbdc   :  { %v2871_v18 = vmul.f32 %v2870_v12, %v2866_v14  ;;  %v2892_v19 = vrot.slane %v2866_v14, 4 }
 0xbdd   :  { %v2877_v20 = vsel %vm2841_vm6, %v2874_v15, %v2875_v11 }
 0xbde   :  { %v2883_v44 = vadd.f32 %v2871_v18, %v2860_v17  ;;  %v2900_v21 = vsel %vm2897_vm7, %v2855_v10, %v2892_v19  ;;  %v2882_v22 = vmul.f32 %v2881_v13, %v2877_v20  ;;  %v2901_v23 = vsel %vm2897_vm7, %v2877_v20, %v2895_v16 }
 0xbdf   :  { %2906 = vst [vmem:[%s3952_s3 + $0x10] sm:$0xff] %v2900_v21  ;;  %v2903_v24 = vsel %vm2902_vm8, %v2901_v23, 0.0 }
 0xbe0   :  { %v2884_v26 = vadd.f32 %v2883_v44, %v2882_v22  ;;  %v2889_v27 = vrot.slane %v2882_v22, 4  ;;  %2907 = vst [vmem:[%s3952_s3 + $0x18] sm:$0xff] %v2903_v24 }
 0xbe2   :  { %v2898_v28 = vsel %vm2897_vm7, %v2884_v26, %v2886_v25  ;;  %v2899_v29 = vsel %vm2897_vm7, %v2871_v18, %v2889_v27 }
 0xbe3   :  { %2904 = vst [vmem:[%s3952_s3] sm:$0xff] %v2898_v28  ;;  %2905 = vst [vmem:[%s3952_s3 + $0x8] sm:$0xff] %v2899_v29 }

</bundles_post_ra>
